<compile_context>
chip_gen: v5e
topology: v5e:2x2
jax: 0.10.0
libtpu: 0.0.40
codegen_flags: <defaults>
</compile_context>

<pallas_src>
import jax
import jax.numpy as jnp
import numpy as np
from jax import lax
from jax.experimental import pallas as pl
from jax.experimental.pallas import tpu as pltpu


def _round_up(x, m):
    return ((x + m - 1) // m) * m


# ---------------------------------------------------------------------------
# Pallas kernel: one M-tile of (TM, K) @ (K, Cp), bias add, per-channel PReLU.
# Inputs are bf16 (MXU-friendly), accumulation and epilogue in f32.
# ---------------------------------------------------------------------------
def _matmul_bias_prelu_kernel(p_ref, w_ref, b_ref, a_ref, o_ref):
    acc = jnp.dot(p_ref[...], w_ref[...], preferred_element_type=jnp.float32)
    acc = acc + b_ref[...]                                   # (1, Cp) broadcast
    o_ref[...] = jnp.where(acc >= 0.0, acc, a_ref[...] * acc)  # PReLU


def _conv3x3_s1_prelu(x_nhwc, w_oihw, b, alpha):
    """3x3 conv (stride 1, pad 1) + bias + per-channel PReLU. NHWC f32 in/out."""
    N, H, W, C_in = x_nhwc.shape
    C_out = w_oihw.shape[0]
    K = 9 * C_in

    # --- glue: im2col, in bf16 so the 9x-inflated patch matrix costs half the HBM ---
    xp = jnp.pad(x_nhwc, ((0, 0), (1, 1), (1, 1), (0, 0))).astype(jnp.bfloat16)
    cols = [xp[:, kh:kh + H, kw:kw + W, :] for kh in range(3) for kw in range(3)]
    # K ordering: ((kh*3 + kw) * C_in + c_in)
    patches = jnp.concatenate(cols, axis=-1).reshape(N * H * W, K)

    M = N * H * W
    TM = 512 if M >= 512 else _round_up(M, 8)      # ~512-row tiles; pipeline-friendly
    M_pad = _round_up(M, TM)
    if M_pad != M:
        patches = jnp.pad(patches, ((0, M_pad - M), (0, 0)))

    # Lane-dense output: pad C_out up to a multiple of 128 (padded cols sliced off).
    Cp = _round_up(max(C_out, 128), 128)
    # (C_out, C_in, kh, kw) -> (kh, kw, C_in, C_out) -> (K, C_out), matches im2col order.
    w2d = jnp.transpose(w_oihw, (2, 3, 1, 0)).reshape(K, C_out).astype(jnp.bfloat16)
    w2d = jnp.pad(w2d, ((0, 0), (0, Cp - C_out)))
    b2d = jnp.pad(b.reshape(1, C_out).astype(jnp.float32), ((0, 0), (0, Cp - C_out)))
    a2d = jnp.pad(alpha.reshape(1, C_out).astype(jnp.float32), ((0, 0), (0, Cp - C_out)))

    cost = pl.CostEstimate(
        flops=2 * M_pad * K * Cp,
        transcendentals=0,
        bytes_accessed=M_pad * K * 2 + K * Cp * 2 + 2 * Cp * 4 + M_pad * Cp * 4,
    )

    out = pl.pallas_call(
        _matmul_bias_prelu_kernel,
        out_shape=jax.ShapeDtypeStruct((M_pad, Cp), jnp.float32),
        grid=(M_pad // TM,),
        in_specs=[
            pl.BlockSpec((TM, K), lambda i: (i, 0)),   # patches: tiled over M (pipelined)
            pl.BlockSpec((K, Cp), lambda i: (0, 0)),   # weights: VMEM-resident across grid
            pl.BlockSpec((1, Cp), lambda i: (0, 0)),   # bias
            pl.BlockSpec((1, Cp), lambda i: (0, 0)),   # PReLU alpha
        ],
        out_specs=pl.BlockSpec((TM, Cp), lambda i: (i, 0)),
        compiler_params=pltpu.CompilerParams(
            dimension_semantics=("parallel",),          # independent M tiles (v7x megacore)
            vmem_limit_bytes=64 * 1024 * 1024,
        ),
        cost_estimate=cost,
    )(patches, w2d, b2d, a2d)

    return out[:M, :C_out].reshape(N, H, W, C_out)


# ---------------------------------------------------------------------------
# Bilinear 2x upsample, PyTorch nn.Upsample(scale_factor=2, mode='bilinear',
# align_corners=False) semantics.  Separable per axis; pure-JAX glue.
#   out[2i]   = 0.25 * in[clamp(i-1)] + 0.75 * in[i]
#   out[2i+1] = 0.75 * in[i]          + 0.25 * in[clamp(i+1)]
# ---------------------------------------------------------------------------
def _upsample2x_axis(x, axis):
    n = x.shape[axis]
    first = lax.slice_in_dim(x, 0, 1, axis=axis)
    last = lax.slice_in_dim(x, n - 1, n, axis=axis)
    prev = jnp.concatenate([first, lax.slice_in_dim(x, 0, n - 1, axis=axis)], axis=axis)
    nxt = jnp.concatenate([lax.slice_in_dim(x, 1, n, axis=axis), last], axis=axis)
    even = 0.25 * prev + 0.75 * x
    odd = 0.75 * x + 0.25 * nxt
    out = jnp.stack([even, odd], axis=axis + 1)
    new_shape = x.shape[:axis] + (2 * n,) + x.shape[axis + 1:]
    return out.reshape(new_shape)


# ---------------------------------------------------------------------------
# up2 forward.  Input/output NCHW float32.
# ---------------------------------------------------------------------------
def up2_forward(x_nchw, skip_nchw, params):
    x = jnp.transpose(x_nchw, (0, 2, 3, 1))               # NCHW -> NHWC
    s = jnp.transpose(skip_nchw, (0, 2, 3, 1))
    x = _upsample2x_axis(_upsample2x_axis(x, 1), 2)        # bilinear 2x (H then W)
    x = _conv3x3_s1_prelu(x, params["w_head"], params["b_head"], params["a_head"])
    x = jnp.concatenate([x, s], axis=-1)                   # torch.cat((x, skip), 1)
    x = _conv3x3_s1_prelu(x, params["w_dec"], params["b_dec"], params["a_dec"])
    x = _conv3x3_s1_prelu(x, params["w_mrg"], params["b_mrg"], params["a_mrg"])
    return jnp.transpose(x, (0, 3, 1, 2))                  # NHWC -> NCHW


def init_params(key, num_in_ch, num_out_ch):
    ks = jax.random.split(key, 6)
    return {
        "w_head": 0.1 * jax.random.normal(ks[0], (num_out_ch, num_in_ch, 3, 3), jnp.float32),
        "b_head": 0.1 * jax.random.normal(ks[1], (num_out_ch,), jnp.float32),
        "a_head": jnp.full((num_out_ch,), 0.25, jnp.float32),       # PReLU default init
        "w_dec": 0.1 * jax.random.normal(ks[2], (num_out_ch, 2 * num_out_ch, 3, 3), jnp.float32),
        "b_dec": 0.1 * jax.random.normal(ks[3], (num_out_ch,), jnp.float32),
        "a_dec": jnp.full((num_out_ch,), 0.25, jnp.float32),
        "w_mrg": 0.1 * jax.random.normal(ks[4], (num_out_ch, num_out_ch, 3, 3), jnp.float32),
        "b_mrg": 0.1 * jax.random.normal(ks[5], (num_out_ch,), jnp.float32),
        "a_mrg": jnp.full((num_out_ch,), 0.25, jnp.float32),
    }


# ---------------------------------------------------------------------------
# Pure-JAX NCHW reference (same bf16-input / f32-accumulate numerics as kernel).
# ---------------------------------------------------------------------------
def _reference(x, skip, params):
    def conv_prelu(x, w, b, a):
        y = lax.conv_general_dilated(
            x.astype(jnp.bfloat16), w.astype(jnp.bfloat16),
            window_strides=(1, 1), padding=((1, 1), (1, 1)),
            dimension_numbers=("NCHW", "OIHW", "NCHW"),
            preferred_element_type=jnp.float32)
        y = y + b.reshape(1, -1, 1, 1)
        return jnp.where(y >= 0, y, a.reshape(1, -1, 1, 1) * y)

    xu = _upsample2x_axis(_upsample2x_axis(x, 2), 3)
    y = conv_prelu(xu, params["w_head"], params["b_head"], params["a_head"])
    y = conv_prelu(jnp.concatenate([y, skip], axis=1),
                   params["w_dec"], params["b_dec"], params["a_dec"])
    y = conv_prelu(y, params["w_mrg"], params["b_mrg"], params["a_mrg"])
    return y


if __name__ == "__main__":
    key = jax.random.PRNGKey(0)
    kx, ks, kp = jax.random.split(key, 3)

    N, C_in, C_out, H, W = 2, 4, 8, 16, 16
    x = jax.random.normal(kx, (N, C_in, H, W), jnp.float32)
    skip = jax.random.normal(ks, (N, C_out, 2 * H, 2 * W), jnp.float32)
    params = init_params(kp, C_in, C_out)

    out = jax.jit(up2_forward)(x, skip, params)
    out = jax.block_until_ready(out)
    assert out.shape == (N, C_out, 2 * H, 2 * W), out.shape

    ref = jax.block_until_ready(jax.jit(_reference)(x, skip, params))
    np.testing.assert_allclose(np.asarray(out), np.asarray(ref), rtol=1e-3, atol=1e-3)

    print("KERNEL_OK")
</pallas_src>

<mosaic_0001>
module attributes {stable_mosaic.version = 11 : i64} {
  func.func @_matmul_bias_prelu_kernel(%arg0: i32, %arg1: memref<512x36xbf16, #tpu.memory_space<vmem>>, %arg2: memref<36x128xbf16, #tpu.memory_space<vmem>>, %arg3: memref<1x128xf32, #tpu.memory_space<vmem>>, %arg4: memref<1x128xf32, #tpu.memory_space<vmem>>, %arg5: memref<512x128xf32, #tpu.memory_space<vmem>>) attributes {dimension_semantics = [#tpu.dimension_semantics<parallel>], iteration_bounds = array<i64: 4>, scalar_prefetch = 0 : i64, scratch_operands = 0 : i64, tpu.core_type = #tpu.core_type<tc>, window_params = [{transform_indices = @transform_0, window_bounds = array<i64: 512, 36>}, {pipeline_mode = #tpu.pipeline_mode<synchronous>, transform_indices = @transform_1, window_bounds = array<i64: 36, 128>}, {pipeline_mode = #tpu.pipeline_mode<synchronous>, transform_indices = @transform_2, window_bounds = array<i64: 1, 128>}, {pipeline_mode = #tpu.pipeline_mode<synchronous>, transform_indices = @transform_3, window_bounds = array<i64: 1, 128>}, {transform_indices = @transform_4, window_bounds = array<i64: 512, 128>}]} {
    %c0 = arith.constant 0 : index
    %c0_0 = arith.constant 0 : index
    %0 = vector.load %arg1[%c0, %c0_0] : memref<512x36xbf16, #tpu.memory_space<vmem>>, vector<512x36xbf16>
    %c0_1 = arith.constant 0 : index
    %c0_2 = arith.constant 0 : index
    %1 = vector.load %arg2[%c0_1, %c0_2] : memref<36x128xbf16, #tpu.memory_space<vmem>>, vector<36x128xbf16>
    %cst = arith.constant dense<0.000000e+00> : vector<512x128xf32>
    %2 = tpu.matmul %0, %1, %cst {dimension_numbers = #tpu.dot_dimension_numbers<[1], [0], [0], [1], [0, 0, 1, 1], [], []>} : vector<512x36xbf16>, vector<36x128xbf16>, vector<512x128xf32> -> vector<512x128xf32>
    %c0_3 = arith.constant 0 : index
    %c0_4 = arith.constant 0 : index
    %3 = vector.load %arg3[%c0_3, %c0_4] : memref<1x128xf32, #tpu.memory_space<vmem>>, vector<1x128xf32>
    %4 = vector.broadcast %3 : vector<1x128xf32> to vector<512x128xf32>
    %5 = arith.addf %2, %4 : vector<512x128xf32>
    %cst_5 = arith.constant 0.000000e+00 : f32
    %6 = vector.broadcast %cst_5 : f32 to vector<512x128xf32>
    %7 = arith.cmpf oge, %5, %6 : vector<512x128xf32>
    %c0_6 = arith.constant 0 : index
    %c0_7 = arith.constant 0 : index
    %8 = vector.load %arg4[%c0_6, %c0_7] : memref<1x128xf32, #tpu.memory_space<vmem>>, vector<1x128xf32>
    %9 = vector.broadcast %8 : vector<1x128xf32> to vector<512x128xf32>
    %10 = arith.mulf %9, %5 : vector<512x128xf32>
    %11 = arith.select %7, %5, %10 : vector<512x128xi1>, vector<512x128xf32>
    %c0_8 = arith.constant 0 : index
    %c0_9 = arith.constant 0 : index
    %12 = vector.load %arg5[%c0_8, %c0_9] : memref<512x128xf32, #tpu.memory_space<vmem>>, vector<512x128xf32>
    tpu.vector_store %arg5[%c0_8, %c0_9], %11 {strides = array<i32>} : memref<512x128xf32, #tpu.memory_space<vmem>>, vector<512x128xf32>,
    return
  }
  func.func @transform_0(%arg0: i32) -> (i32, i32) {
    %c0_i32 = arith.constant 0 : i32
    %c0_i32_0 = arith.constant 0 : i32
    return %arg0, %c0_i32 : i32, i32
  }
  func.func @transform_1(%arg0: i32) -> (i32, i32) {
    %c0_i32 = arith.constant 0 : i32
    %c0_i32_0 = arith.constant 0 : i32
    %c0_i32_1 = arith.constant 0 : i32
    return %c0_i32, %c0_i32_0 : i32, i32
  }
  func.func @transform_2(%arg0: i32) -> (i32, i32) {
    %c0_i32 = arith.constant 0 : i32
    %c0_i32_0 = arith.constant 0 : i32
    %c0_i32_1 = arith.constant 0 : i32
    return %c0_i32, %c0_i32_0 : i32, i32
  }
  func.func @transform_3(%arg0: i32) -> (i32, i32) {
    %c0_i32 = arith.constant 0 : i32
    %c0_i32_0 = arith.constant 0 : i32
    %c0_i32_1 = arith.constant 0 : i32
    return %c0_i32, %c0_i32_0 : i32, i32
  }
  func.func @transform_4(%arg0: i32) -> (i32, i32) {
    %c0_i32 = arith.constant 0 : i32
    %c0_i32_0 = arith.constant 0 : i32
    return %arg0, %c0_i32 : i32, i32
  }
}

module attributes {stable_mosaic.version = 11 : i64} {
  func.func @_matmul_bias_prelu_kernel(%arg0: i32, %arg1: memref<512x144xbf16, #tpu.memory_space<vmem>>, %arg2: memref<144x128xbf16, #tpu.memory_space<vmem>>, %arg3: memref<1x128xf32, #tpu.memory_space<vmem>>, %arg4: memref<1x128xf32, #tpu.memory_space<vmem>>, %arg5: memref<512x128xf32, #tpu.memory_space<vmem>>) attributes {dimension_semantics = [#tpu.dimension_semantics<parallel>], iteration_bounds = array<i64: 4>, scalar_prefetch = 0 : i64, scratch_operands = 0 : i64, tpu.core_type = #tpu.core_type<tc>, window_params = [{transform_indices = @transform_0, window_bounds = array<i64: 512, 144>}, {pipeline_mode = #tpu.pipeline_mode<synchronous>, transform_indices = @transform_1, window_bounds = array<i64: 144, 128>}, {pipeline_mode = #tpu.pipeline_mode<synchronous>, transform_indices = @transform_2, window_bounds = array<i64: 1, 128>}, {pipeline_mode = #tpu.pipeline_mode<synchronous>, transform_indices = @transform_3, window_bounds = array<i64: 1, 128>}, {transform_indices = @transform_4, window_bounds = array<i64: 512, 128>}]} {
    %c0 = arith.constant 0 : index
    %c0_0 = arith.constant 0 : index
    %0 = vector.load %arg1[%c0, %c0_0] : memref<512x144xbf16, #tpu.memory_space<vmem>>, vector<512x144xbf16>
    %c0_1 = arith.constant 0 : index
    %c0_2 = arith.constant 0 : index
    %1 = vector.load %arg2[%c0_1, %c0_2] : memref<144x128xbf16, #tpu.memory_space<vmem>>, vector<144x128xbf16>
    %cst = arith.constant dense<0.000000e+00> : vector<512x128xf32>
    %2 = tpu.matmul %0, %1, %cst {dimension_numbers = #tpu.dot_dimension_numbers<[1], [0], [0], [1], [0, 0, 1, 1], [], []>} : vector<512x144xbf16>, vector<144x128xbf16>, vector<512x128xf32> -> vector<512x128xf32>
    %c0_3 = arith.constant 0 : index
    %c0_4 = arith.constant 0 : index
    %3 = vector.load %arg3[%c0_3, %c0_4] : memref<1x128xf32, #tpu.memory_space<vmem>>, vector<1x128xf32>
    %4 = vector.broadcast %3 : vector<1x128xf32> to vector<512x128xf32>
    %5 = arith.addf %2, %4 : vector<512x128xf32>
    %cst_5 = arith.constant 0.000000e+00 : f32
    %6 = vector.broadcast %cst_5 : f32 to vector<512x128xf32>
    %7 = arith.cmpf oge, %5, %6 : vector<512x128xf32>
    %c0_6 = arith.constant 0 : index
    %c0_7 = arith.constant 0 : index
    %8 = vector.load %arg4[%c0_6, %c0_7] : memref<1x128xf32, #tpu.memory_space<vmem>>, vector<1x128xf32>
    %9 = vector.broadcast %8 : vector<1x128xf32> to vector<512x128xf32>
    %10 = arith.mulf %9, %5 : vector<512x128xf32>
    %11 = arith.select %7, %5, %10 : vector<512x128xi1>, vector<512x128xf32>
    %c0_8 = arith.constant 0 : index
    %c0_9 = arith.constant 0 : index
    %12 = vector.load %arg5[%c0_8, %c0_9] : memref<512x128xf32, #tpu.memory_space<vmem>>, vector<512x128xf32>
    tpu.vector_store %arg5[%c0_8, %c0_9], %11 {strides = array<i32>} : memref<512x128xf32, #tpu.memory_space<vmem>>, vector<512x128xf32>,
    return
  }
  func.func @transform_0(%arg0: i32) -> (i32, i32) {
    %c0_i32 = arith.constant 0 : i32
    %c0_i32_0 = arith.constant 0 : i32
    return %arg0, %c0_i32 : i32, i32
  }
  func.func @transform_1(%arg0: i32) -> (i32, i32) {
    %c0_i32 = arith.constant 0 : i32
    %c0_i32_0 = arith.constant 0 : i32
    %c0_i32_1 = arith.constant 0 : i32
    return %c0_i32, %c0_i32_0 : i32, i32
  }
  func.func @transform_2(%arg0: i32) -> (i32, i32) {
    %c0_i32 = arith.constant 0 : i32
    %c0_i32_0 = arith.constant 0 : i32
    %c0_i32_1 = arith.constant 0 : i32
    return %c0_i32, %c0_i32_0 : i32, i32
  }
  func.func @transform_3(%arg0: i32) -> (i32, i32) {
    %c0_i32 = arith.constant 0 : i32
    %c0_i32_0 = arith.constant 0 : i32
    %c0_i32_1 = arith.constant 0 : i32
    return %c0_i32, %c0_i32_0 : i32, i32
  }
  func.func @transform_4(%arg0: i32) -> (i32, i32) {
    %c0_i32 = arith.constant 0 : i32
    %c0_i32_0 = arith.constant 0 : i32
    return %arg0, %c0_i32 : i32, i32
  }
}

module attributes {stable_mosaic.version = 11 : i64} {
  func.func @_matmul_bias_prelu_kernel(%arg0: i32, %arg1: memref<512x72xbf16, #tpu.memory_space<vmem>>, %arg2: memref<72x128xbf16, #tpu.memory_space<vmem>>, %arg3: memref<1x128xf32, #tpu.memory_space<vmem>>, %arg4: memref<1x128xf32, #tpu.memory_space<vmem>>, %arg5: memref<512x128xf32, #tpu.memory_space<vmem>>) attributes {dimension_semantics = [#tpu.dimension_semantics<parallel>], iteration_bounds = array<i64: 4>, scalar_prefetch = 0 : i64, scratch_operands = 0 : i64, tpu.core_type = #tpu.core_type<tc>, window_params = [{transform_indices = @transform_0, window_bounds = array<i64: 512, 72>}, {pipeline_mode = #tpu.pipeline_mode<synchronous>, transform_indices = @transform_1, window_bounds = array<i64: 72, 128>}, {pipeline_mode = #tpu.pipeline_mode<synchronous>, transform_indices = @transform_2, window_bounds = array<i64: 1, 128>}, {pipeline_mode = #tpu.pipeline_mode<synchronous>, transform_indices = @transform_3, window_bounds = array<i64: 1, 128>}, {transform_indices = @transform_4, window_bounds = array<i64: 512, 128>}]} {
    %c0 = arith.constant 0 : index
    %c0_0 = arith.constant 0 : index
    %0 = vector.load %arg1[%c0, %c0_0] : memref<512x72xbf16, #tpu.memory_space<vmem>>, vector<512x72xbf16>
    %c0_1 = arith.constant 0 : index
    %c0_2 = arith.constant 0 : index
    %1 = vector.load %arg2[%c0_1, %c0_2] : memref<72x128xbf16, #tpu.memory_space<vmem>>, vector<72x128xbf16>
    %cst = arith.constant dense<0.000000e+00> : vector<512x128xf32>
    %2 = tpu.matmul %0, %1, %cst {dimension_numbers = #tpu.dot_dimension_numbers<[1], [0], [0], [1], [0, 0, 1, 1], [], []>} : vector<512x72xbf16>, vector<72x128xbf16>, vector<512x128xf32> -> vector<512x128xf32>
    %c0_3 = arith.constant 0 : index
    %c0_4 = arith.constant 0 : index
    %3 = vector.load %arg3[%c0_3, %c0_4] : memref<1x128xf32, #tpu.memory_space<vmem>>, vector<1x128xf32>
    %4 = vector.broadcast %3 : vector<1x128xf32> to vector<512x128xf32>
    %5 = arith.addf %2, %4 : vector<512x128xf32>
    %cst_5 = arith.constant 0.000000e+00 : f32
    %6 = vector.broadcast %cst_5 : f32 to vector<512x128xf32>
    %7 = arith.cmpf oge, %5, %6 : vector<512x128xf32>
    %c0_6 = arith.constant 0 : index
    %c0_7 = arith.constant 0 : index
    %8 = vector.load %arg4[%c0_6, %c0_7] : memref<1x128xf32, #tpu.memory_space<vmem>>, vector<1x128xf32>
    %9 = vector.broadcast %8 : vector<1x128xf32> to vector<512x128xf32>
    %10 = arith.mulf %9, %5 : vector<512x128xf32>
    %11 = arith.select %7, %5, %10 : vector<512x128xi1>, vector<512x128xf32>
    %c0_8 = arith.constant 0 : index
    %c0_9 = arith.constant 0 : index
    %12 = vector.load %arg5[%c0_8, %c0_9] : memref<512x128xf32, #tpu.memory_space<vmem>>, vector<512x128xf32>
    tpu.vector_store %arg5[%c0_8, %c0_9], %11 {strides = array<i32>} : memref<512x128xf32, #tpu.memory_space<vmem>>, vector<512x128xf32>,
    return
  }
  func.func @transform_0(%arg0: i32) -> (i32, i32) {
    %c0_i32 = arith.constant 0 : i32
    %c0_i32_0 = arith.constant 0 : i32
    return %arg0, %c0_i32 : i32, i32
  }
  func.func @transform_1(%arg0: i32) -> (i32, i32) {
    %c0_i32 = arith.constant 0 : i32
    %c0_i32_0 = arith.constant 0 : i32
    %c0_i32_1 = arith.constant 0 : i32
    return %c0_i32, %c0_i32_0 : i32, i32
  }
  func.func @transform_2(%arg0: i32) -> (i32, i32) {
    %c0_i32 = arith.constant 0 : i32
    %c0_i32_0 = arith.constant 0 : i32
    %c0_i32_1 = arith.constant 0 : i32
    return %c0_i32, %c0_i32_0 : i32, i32
  }
  func.func @transform_3(%arg0: i32) -> (i32, i32) {
    %c0_i32 = arith.constant 0 : i32
    %c0_i32_0 = arith.constant 0 : i32
    %c0_i32_1 = arith.constant 0 : i32
    return %c0_i32, %c0_i32_0 : i32, i32
  }
  func.func @transform_4(%arg0: i32) -> (i32, i32) {
    %c0_i32 = arith.constant 0 : i32
    %c0_i32_0 = arith.constant 0 : i32
    return %arg0, %c0_i32 : i32, i32
  }
}

</mosaic_0001>

<bundles_post_ra>
// kernel: up2_forward.3
= control target key start
LH: loop header
LB: loop body
LE: loop exit
PB: predicated region body
PF: predicated region fallthrough
CT: control target
= control target key end

     0   :  { %s1301_s15 = smov 0   ;;  %s1601_s0 = inlined_call_operand.vmem [shape: bf16[2048,36], index: 0, kind: input, shape index: {}]   ;;  %s1602_s1 = inlined_call_operand.vmem [shape: bf16[36,128], index: 1, kind: input, shape index: {}]   ;;  %s1603_s2 = inlined_call_operand.vmem [shape: f32[1,128], index: 2, kind: input, shape index: {}]   ;;  %s1604_s3 = inlined_call_operand.vmem [shape: f32[1,128], index: 3, kind: input, shape index: {}]   ;;  %s1605_s4 = inlined_call_operand.vmem [shape: f32[2048,128], index: 4, kind: output, shape index: {}]  }
   0x1 LB: > { %s1036_s16 = sadd.s32 4294967295, %s1274_s15   ;;  %p1040_p0 = scmp.ge.s32.totalorder %s1274_s15, 1  ;;  %s1274_s15 = sphi %s1301_s15, %s14_s15  }
   0x2   : > { %p163_p1 = scmp.lt.s32.totalorder %s1274_s15, 5 }
   0x4   : > { %p164_p2 = pnand %p1040_p0, %p163_p1 }
   0x5   : > { %s1041_s19 = sshll.u32 (!%p164_p2), %s1036_s16, 6 }
   0x6   : > { %167 = sbr.rel (%p164_p2) target bundleno = 288 (0x120), region = 36  ;;  %p190_p3 = scmp.lt.s32.totalorder (!%p164_p2), %s1041_s19, 255 }
   0xb   : > { %v270_v0 = vld [vmem:[%s1602_s1 + $0x10] sm:$0x3]  ;;  %vm547_vm0 = vcmask 1041408   ;;  %s1607_s19 = smov (!%p190_p3, %s1041_s19), 255  ;;  %v1248_v4 = vld [vmem:[%s1602_s1 + $0x8] sm:$0xff]  ;;  %v1247_v5 = vld [vmem:[%s1602_s1] sm:$0xff] }
   0xc   : > { %v444_v1 = vunpack.c.l.b16 %v270_v0  ;;  %s1042_s22 = sshll.u32 %s1607_s19, 2  ;;  %vm450_vm1 = vcmask 293888   ;;  %v1393_v38 = vld [vmem:[%s1603_s2] ss:$0 sm:$0xff]  ;;  %s1044_s6 = sshll.u32 %s1607_s19, 3 }
   0xd   : > { %s1324_s27 = scalar_lea.vmem %s1601_s0, %s1042_s22  ;;  %v1398_v39 = vld [vmem:[%s1604_s3] ss:$0 sm:$0xff]  ;;  %s1406_s9 = scalar_lea.vmem %s1605_s4, %s1044_s6 }
   0xe   : > { %v447_v2 = vpack.c.b16 %v444_v1, %v444_v1  ;;  %v1215_v6 = vld [vmem:[%s1324_s27] sm:$0xff]  ;;  %v1216_v10 = vld [vmem:[%s1324_s27 + $0x8] sm:$0xff]  ;;  %v1217_v14 = vld [vmem:[%s1324_s27 + $0x10] sm:$0xff] }
   0xf   : > { %v1223_v7 = vld [vmem:[%s1324_s27 + $0x40] sm:$0xff]  ;;  %v1224_v11 = vld [vmem:[%s1324_s27 + $0x48] sm:$0xff]  ;;  %v1225_v15 = vld [vmem:[%s1324_s27 + $0x50] sm:$0xff] }
  0x10   : > { %v549_v3 = vsel %vm547_vm0, %v447_v2, 0  ;;  %v1231_v8 = vld [vmem:[%s1324_s27 + $0x80] sm:$0xff]  ;;  %v1232_v12 = vld [vmem:[%s1324_s27 + $0x88] sm:$0xff]  ;;  %v1233_v16 = vld [vmem:[%s1324_s27 + $0x90] sm:$0xff] }
  0x11   : > { %556 = vmatpush.bf16.msra.mxu0 %v549_v3  ;;  %1249 = vmatpush.bf16.msra.mxu1 %v549_v3  ;;  %v1239_v9 = vld [vmem:[%s1324_s27 + $0xc0] sm:$0xff]  ;;  %v1240_v13 = vld [vmem:[%s1324_s27 + $0xc8] sm:$0xff]  ;;  %v1241_v17 = vld [vmem:[%s1324_s27 + $0xd0] sm:$0xff] }
  0x12   : > { %1250 = vmatpush.bf16.msra.mxu2 %v549_v3  ;;  %1251 = vmatpush.bf16.msra.mxu3 %v549_v3  ;;  %v1218_v18 = vld [vmem:[%s1324_s27 + $0x18] sm:$0xff]  ;;  %v1219_v22 = vld [vmem:[%s1324_s27 + $0x20] sm:$0xff]  ;;  %v1220_v26 = vld [vmem:[%s1324_s27 + $0x28] sm:$0xff] }
  0x13   : > { %v1226_v19 = vld [vmem:[%s1324_s27 + $0x58] sm:$0xff]  ;;  %v1227_v23 = vld [vmem:[%s1324_s27 + $0x60] sm:$0xff]  ;;  %v1228_v27 = vld [vmem:[%s1324_s27 + $0x68] sm:$0xff] }
  0x14   : > { %v1234_v20 = vld [vmem:[%s1324_s27 + $0x98] sm:$0xff]  ;;  %v1235_v24 = vld [vmem:[%s1324_s27 + $0xa0] sm:$0xff]  ;;  %v1236_v28 = vld [vmem:[%s1324_s27 + $0xa8] sm:$0xff] }
  0x15   : > { %557 = vmatpush.bf16.msra.mxu0 %v1248_v4  ;;  %1252 = vmatpush.bf16.msra.mxu1 %v1248_v4  ;;  %v1242_v21 = vld [vmem:[%s1324_s27 + $0xd8] sm:$0xff]  ;;  %v1243_v25 = vld [vmem:[%s1324_s27 + $0xe0] sm:$0xff]  ;;  %v1244_v29 = vld [vmem:[%s1324_s27 + $0xe8] sm:$0xff] }
  0x16   : > { %1253 = vmatpush.bf16.msra.mxu2 %v1248_v4  ;;  %1254 = vmatpush.bf16.msra.mxu3 %v1248_v4  ;;  %v1221_v30 = vld [vmem:[%s1324_s27 + $0x30] sm:$0xff]  ;;  %v1222_v34 = vld [vmem:[%s1324_s27 + $0x38] sm:$0xff] }
  0x17   : > { %v1229_v31 = vld [vmem:[%s1324_s27 + $0x70] sm:$0xff]  ;;  %v1230_v35 = vld [vmem:[%s1324_s27 + $0x78] sm:$0xff] }
  0x18   : > { %v1237_v32 = vld [vmem:[%s1324_s27 + $0xb0] sm:$0xff]  ;;  %v1238_v36 = vld [vmem:[%s1324_s27 + $0xb8] sm:$0xff] }
  0x19   : > { %558 = vmatpush.bf16.msra.mxu0 %v1247_v5  ;;  %1255 = vmatpush.bf16.msra.mxu1 %v1247_v5  ;;  %v1245_v33 = vld [vmem:[%s1324_s27 + $0xf0] sm:$0xff]  ;;  %v1246_v37 = vld [vmem:[%s1324_s27 + $0xf8] sm:$0xff] }
  0x1a   : > { %1256 = vmatpush.bf16.msra.mxu2 %v1247_v5  ;;  %1257 = vmatpush.bf16.msra.mxu3 %v1247_v5 }
  0x1c   : > { %1181 = vmatmul.msk.bf16.vlgmr.msra.gmra.mxu0 %vm450_vm1, %v1215_v6  ;;  %1189 = vmatmul.msk.bf16.vlgmr.msra.gmra.mxu1 %vm450_vm1, %v1223_v7 }
  0x1d   : > { %1197 = vmatmul.msk.bf16.vlgmr.msra.gmra.mxu2 %vm450_vm1, %v1231_v8  ;;  %1205 = vmatmul.msk.bf16.vlgmr.msra.gmra.mxu3 %vm450_vm1, %v1239_v9 }
  0x2c   : > { %1182 = vmatmul.msk.bf16.gmra.mxu0 %vm450_vm1, %v1216_v10  ;;  %1190 = vmatmul.msk.bf16.gmra.mxu1 %vm450_vm1, %v1224_v11 }
  0x2d   : > { %1198 = vmatmul.msk.bf16.gmra.mxu2 %vm450_vm1, %v1232_v12  ;;  %1206 = vmatmul.msk.bf16.gmra.mxu3 %vm450_vm1, %v1240_v13 }
  0x3c   : > { %1183 = vmatmul.msk.bf16.gmra.mxu0 %vm450_vm1, %v1217_v14  ;;  %1191 = vmatmul.msk.bf16.gmra.mxu1 %vm450_vm1, %v1225_v15 }
  0x3d   : > { %1199 = vmatmul.msk.bf16.gmra.mxu2 %vm450_vm1, %v1233_v16  ;;  %1207 = vmatmul.msk.bf16.gmra.mxu3 %vm450_vm1, %v1241_v17 }
  0x4c   : > { %1184 = vmatmul.msk.bf16.gmra.mxu0 %vm450_vm1, %v1218_v18  ;;  %1192 = vmatmul.msk.bf16.gmra.mxu1 %vm450_vm1, %v1226_v19 }
  0x4d   : > { %1200 = vmatmul.msk.bf16.gmra.mxu2 %vm450_vm1, %v1234_v20  ;;  %1208 = vmatmul.msk.bf16.gmra.mxu3 %vm450_vm1, %v1242_v21 }
  0x5c   : > { %1185 = vmatmul.msk.bf16.gmra.mxu0 %vm450_vm1, %v1219_v22  ;;  %1193 = vmatmul.msk.bf16.gmra.mxu1 %vm450_vm1, %v1227_v23 }
  0x5d   : > { %1201 = vmatmul.msk.bf16.gmra.mxu2 %vm450_vm1, %v1235_v24  ;;  %1209 = vmatmul.msk.bf16.gmra.mxu3 %vm450_vm1, %v1243_v25 }
  0x6c   : > { %1186 = vmatmul.msk.bf16.gmra.mxu0 %vm450_vm1, %v1220_v26  ;;  %1194 = vmatmul.msk.bf16.gmra.mxu1 %vm450_vm1, %v1228_v27 }
  0x6d   : > { %1202 = vmatmul.msk.bf16.gmra.mxu2 %vm450_vm1, %v1236_v28  ;;  %1210 = vmatmul.msk.bf16.gmra.mxu3 %vm450_vm1, %v1244_v29 }
  0x7c   : > { %1187 = vmatmul.msk.bf16.gmra.mxu0 %vm450_vm1, %v1221_v30  ;;  %1195 = vmatmul.msk.bf16.gmra.mxu1 %vm450_vm1, %v1229_v31 }
  0x7d   : > { %1203 = vmatmul.msk.bf16.gmra.mxu2 %vm450_vm1, %v1237_v32  ;;  %1211 = vmatmul.msk.bf16.gmra.mxu3 %vm450_vm1, %v1245_v33 }
  0x8c   : > { %1188 = vmatmul.msk.bf16.gmra.mxu0 %vm450_vm1, %v1222_v34  ;;  %1196 = vmatmul.msk.bf16.gmra.mxu1 %vm450_vm1, %v1230_v35 }
  0x8d   : > { %1204 = vmatmul.msk.bf16.gmra.mxu2 %vm450_vm1, %v1238_v36  ;;  %1212 = vmatmul.msk.bf16.gmra.mxu3 %vm450_vm1, %v1246_v37 }
  0x99   : > { %v560_v40 = vpop.f32.mrf.mxu0  ;;  %v600_v41 = vpop.f32.mrf.mxu1 }
  0x9a   : > { %v561_v42 = vadd.f32 %v1393_v38, %v560_v40  ;;  %v601_v43 = vadd.f32 %v1393_v38, %v600_v41 }
  0x9c   : > { %vm720_vm2 = vcmp.ge.f32.partialorder %v561_v42, 0.0  ;;  %v788_v44 = vmul.f32 %v1398_v39, %v561_v42  ;;  %vm736_vm3 = vcmp.ge.f32.partialorder %v601_v43, 0.0  ;;  %v804_v45 = vmul.f32 %v1398_v39, %v601_v43 }
  0x9e   : > { %v852_v46 = vsel %vm720_vm2, %v561_v42, %v788_v44  ;;  %v868_v47 = vsel %vm736_vm3, %v601_v43, %v804_v45 }
  0x9f   : > { %916 = vst [vmem:[%s1406_s9] sm:$0xff] %v852_v46 }
  0xa0   : > { %932 = vst [vmem:[%s1406_s9 + $0x80] sm:$0xff] %v868_v47  ;;  %v640_v48 = vpop.f32.mrf.mxu2  ;;  %v680_v49 = vpop.f32.mrf.mxu3 }
  0xa1   : > { %v641_v50 = vadd.f32 %v1393_v38, %v640_v48  ;;  %v681_v51 = vadd.f32 %v1393_v38, %v680_v49  ;;  %v562_v52 = vpop.f32.mrf.mxu0  ;;  %v602_v53 = vpop.f32.mrf.mxu1 }
  0xa2   : > { %v563_v54 = vadd.f32 %v1393_v38, %v562_v52  ;;  %v603_v55 = vadd.f32 %v1393_v38, %v602_v53 }
  0xa3   : > { %vm752_vm4 = vcmp.ge.f32.partialorder %v641_v50, 0.0  ;;  %v820_v56 = vmul.f32 %v1398_v39, %v641_v50  ;;  %vm768_vm5 = vcmp.ge.f32.partialorder %v681_v51, 0.0  ;;  %v836_v57 = vmul.f32 %v1398_v39, %v681_v51 }
  0xa4   : > { %vm721_vm6 = vcmp.ge.f32.partialorder %v563_v54, 0.0  ;;  %v789_v58 = vmul.f32 %v1398_v39, %v563_v54  ;;  %vm737_vm7 = vcmp.ge.f32.partialorder %v603_v55, 0.0  ;;  %v805_v59 = vmul.f32 %v1398_v39, %v603_v55 }
  0xa5   : > { %v884_v60 = vsel %vm752_vm4, %v641_v50, %v820_v56  ;;  %v900_v61 = vsel %vm768_vm5, %v681_v51, %v836_v57 }
  0xa6   : > { %948 = vst [vmem:[%s1406_s9 + $0x100] sm:$0xff] %v884_v60  ;;  %v853_v62 = vsel %vm721_vm6, %v563_v54, %v789_v58  ;;  %v869_v63 = vsel %vm737_vm7, %v603_v55, %v805_v59 }
  0xa7   : > { %964 = vst [vmem:[%s1406_s9 + $0x180] sm:$0xff] %v900_v61 }
  0xa8   : > { %917 = vst [vmem:[%s1406_s9 + $0x8] sm:$0xff] %v853_v62  ;;  %v642_v0 = vpop.f32.mrf.mxu2  ;;  %v682_v1 = vpop.f32.mrf.mxu3 }
  0xa9   : > { %933 = vst [vmem:[%s1406_s9 + $0x88] sm:$0xff] %v869_v63  ;;  %v643_v2 = vadd.f32 %v1393_v38, %v642_v0  ;;  %v683_v3 = vadd.f32 %v1393_v38, %v682_v1  ;;  %v565_v4 = vpop.f32.mrf.mxu0  ;;  %v605_v5 = vpop.f32.mrf.mxu1 }
  0xaa   : > { %v566_v6 = vadd.f32 %v1393_v38, %v565_v4  ;;  %v606_v7 = vadd.f32 %v1393_v38, %v605_v5 }
  0xab   : > { %vm753_vm8 = vcmp.ge.f32.partialorder %v643_v2, 0.0  ;;  %v821_v8 = vmul.f32 %v1398_v39, %v643_v2  ;;  %vm769_vm9 = vcmp.ge.f32.partialorder %v683_v3, 0.0  ;;  %v837_v9 = vmul.f32 %v1398_v39, %v683_v3 }
  0xac   : > { %vm722_vm10 = vcmp.ge.f32.partialorder %v566_v6, 0.0  ;;  %v790_v10 = vmul.f32 %v1398_v39, %v566_v6  ;;  %vm738_vm11 = vcmp.ge.f32.partialorder %v606_v7, 0.0  ;;  %v806_v11 = vmul.f32 %v1398_v39, %v606_v7 }
  0xad   : > { %v885_v12 = vsel %vm753_vm8, %v643_v2, %v821_v8  ;;  %v901_v13 = vsel %vm769_vm9, %v683_v3, %v837_v9 }
  0xae   : > { %949 = vst [vmem:[%s1406_s9 + $0x108] sm:$0xff] %v885_v12  ;;  %v854_v14 = vsel %vm722_vm10, %v566_v6, %v790_v10  ;;  %v870_v15 = vsel %vm738_vm11, %v606_v7, %v806_v11 }
  0xaf   : > { %965 = vst [vmem:[%s1406_s9 + $0x188] sm:$0xff] %v901_v13 }
  0xb0   : > { %918 = vst [vmem:[%s1406_s9 + $0x10] sm:$0xff] %v854_v14  ;;  %v645_v16 = vpop.f32.mrf.mxu2  ;;  %v685_v17 = vpop.f32.mrf.mxu3 }
  0xb1   : > { %934 = vst [vmem:[%s1406_s9 + $0x90] sm:$0xff] %v870_v15  ;;  %v646_v18 = vadd.f32 %v1393_v38, %v645_v16  ;;  %v686_v19 = vadd.f32 %v1393_v38, %v685_v17  ;;  %v567_v20 = vpop.f32.mrf.mxu0  ;;  %v607_v21 = vpop.f32.mrf.mxu1 }
  0xb2   : > { %v568_v22 = vadd.f32 %v1393_v38, %v567_v20  ;;  %v608_v23 = vadd.f32 %v1393_v38, %v607_v21 }
  0xb3   : > { %vm754_vm12 = vcmp.ge.f32.partialorder %v646_v18, 0.0  ;;  %v822_v24 = vmul.f32 %v1398_v39, %v646_v18  ;;  %vm770_vm13 = vcmp.ge.f32.partialorder %v686_v19, 0.0  ;;  %v838_v25 = vmul.f32 %v1398_v39, %v686_v19 }
  0xb4   : > { %vm723_vm14 = vcmp.ge.f32.partialorder %v568_v22, 0.0  ;;  %v791_v26 = vmul.f32 %v1398_v39, %v568_v22  ;;  %vm739_vm15 = vcmp.ge.f32.partialorder %v608_v23, 0.0  ;;  %v807_v27 = vmul.f32 %v1398_v39, %v608_v23 }
  0xb5   : > { %v886_v28 = vsel %vm754_vm12, %v646_v18, %v822_v24  ;;  %v902_v29 = vsel %vm770_vm13, %v686_v19, %v838_v25 }
  0xb6   : > { %950 = vst [vmem:[%s1406_s9 + $0x110] sm:$0xff] %v886_v28  ;;  %v855_v30 = vsel %vm723_vm14, %v568_v22, %v791_v26  ;;  %v871_v31 = vsel %vm739_vm15, %v608_v23, %v807_v27 }
  0xb7   : > { %966 = vst [vmem:[%s1406_s9 + $0x190] sm:$0xff] %v902_v29 }
  0xb8   : > { %919 = vst [vmem:[%s1406_s9 + $0x18] sm:$0xff] %v855_v30  ;;  %v647_v32 = vpop.f32.mrf.mxu2  ;;  %v687_v33 = vpop.f32.mrf.mxu3 }
  0xb9   : > { %935 = vst [vmem:[%s1406_s9 + $0x98] sm:$0xff] %v871_v31  ;;  %v648_v34 = vadd.f32 %v1393_v38, %v647_v32  ;;  %v688_v35 = vadd.f32 %v1393_v38, %v687_v33  ;;  %v570_v36 = vpop.f32.mrf.mxu0  ;;  %v610_v37 = vpop.f32.mrf.mxu1 }
  0xba   : > { %v571_v40 = vadd.f32 %v1393_v38, %v570_v36  ;;  %v611_v41 = vadd.f32 %v1393_v38, %v610_v37 }
  0xbb   : > { %vm755_vm0 = vcmp.ge.f32.partialorder %v648_v34, 0.0  ;;  %v823_v42 = vmul.f32 %v1398_v39, %v648_v34  ;;  %vm771_vm1 = vcmp.ge.f32.partialorder %v688_v35, 0.0  ;;  %v839_v43 = vmul.f32 %v1398_v39, %v688_v35 }
  0xbc   : > { %vm724_vm2 = vcmp.ge.f32.partialorder %v571_v40, 0.0  ;;  %v792_v44 = vmul.f32 %v1398_v39, %v571_v40  ;;  %vm740_vm3 = vcmp.ge.f32.partialorder %v611_v41, 0.0  ;;  %v808_v45 = vmul.f32 %v1398_v39, %v611_v41 }
  0xbd   : > { %v887_v46 = vsel %vm755_vm0, %v648_v34, %v823_v42  ;;  %v903_v47 = vsel %vm771_vm1, %v688_v35, %v839_v43 }
  0xbe   : > { %951 = vst [vmem:[%s1406_s9 + $0x118] sm:$0xff] %v887_v46  ;;  %v856_v48 = vsel %vm724_vm2, %v571_v40, %v792_v44  ;;  %v872_v49 = vsel %vm740_vm3, %v611_v41, %v808_v45 }
  0xbf   : > { %967 = vst [vmem:[%s1406_s9 + $0x198] sm:$0xff] %v903_v47 }
  0xc0   : > { %920 = vst [vmem:[%s1406_s9 + $0x20] sm:$0xff] %v856_v48  ;;  %v650_v50 = vpop.f32.mrf.mxu2  ;;  %v690_v51 = vpop.f32.mrf.mxu3 }
  0xc1   : > { %936 = vst [vmem:[%s1406_s9 + $0xa0] sm:$0xff] %v872_v49  ;;  %v651_v52 = vadd.f32 %v1393_v38, %v650_v50  ;;  %v691_v53 = vadd.f32 %v1393_v38, %v690_v51  ;;  %v572_v54 = vpop.f32.mrf.mxu0  ;;  %v612_v55 = vpop.f32.mrf.mxu1 }
  0xc2   : > { %v573_v56 = vadd.f32 %v1393_v38, %v572_v54  ;;  %v613_v57 = vadd.f32 %v1393_v38, %v612_v55 }
  0xc3   : > { %vm756_vm4 = vcmp.ge.f32.partialorder %v651_v52, 0.0  ;;  %v824_v58 = vmul.f32 %v1398_v39, %v651_v52  ;;  %vm772_vm5 = vcmp.ge.f32.partialorder %v691_v53, 0.0  ;;  %v840_v59 = vmul.f32 %v1398_v39, %v691_v53 }
  0xc4   : > { %vm725_vm6 = vcmp.ge.f32.partialorder %v573_v56, 0.0  ;;  %v793_v60 = vmul.f32 %v1398_v39, %v573_v56  ;;  %vm741_vm7 = vcmp.ge.f32.partialorder %v613_v57, 0.0  ;;  %v809_v61 = vmul.f32 %v1398_v39, %v613_v57 }
  0xc5   : > { %v888_v62 = vsel %vm756_vm4, %v651_v52, %v824_v58  ;;  %v904_v63 = vsel %vm772_vm5, %v691_v53, %v840_v59 }
  0xc6   : > { %952 = vst [vmem:[%s1406_s9 + $0x120] sm:$0xff] %v888_v62  ;;  %v857_v0 = vsel %vm725_vm6, %v573_v56, %v793_v60  ;;  %v873_v1 = vsel %vm741_vm7, %v613_v57, %v809_v61 }
  0xc7   : > { %968 = vst [vmem:[%s1406_s9 + $0x1a0] sm:$0xff] %v904_v63 }
  0xc8   : > { %921 = vst [vmem:[%s1406_s9 + $0x28] sm:$0xff] %v857_v0  ;;  %v652_v2 = vpop.f32.mrf.mxu2  ;;  %v692_v3 = vpop.f32.mrf.mxu3 }
  0xc9   : > { %937 = vst [vmem:[%s1406_s9 + $0xa8] sm:$0xff] %v873_v1  ;;  %v653_v4 = vadd.f32 %v1393_v38, %v652_v2  ;;  %v693_v5 = vadd.f32 %v1393_v38, %v692_v3  ;;  %v575_v6 = vpop.f32.mrf.mxu0  ;;  %v615_v7 = vpop.f32.mrf.mxu1 }
  0xca   : > { %v576_v8 = vadd.f32 %v1393_v38, %v575_v6  ;;  %v616_v9 = vadd.f32 %v1393_v38, %v615_v7 }
  0xcb   : > { %vm757_vm8 = vcmp.ge.f32.partialorder %v653_v4, 0.0  ;;  %v825_v10 = vmul.f32 %v1398_v39, %v653_v4  ;;  %vm773_vm9 = vcmp.ge.f32.partialorder %v693_v5, 0.0  ;;  %v841_v11 = vmul.f32 %v1398_v39, %v693_v5 }
  0xcc   : > { %vm726_vm10 = vcmp.ge.f32.partialorder %v576_v8, 0.0  ;;  %v794_v12 = vmul.f32 %v1398_v39, %v576_v8  ;;  %vm742_vm11 = vcmp.ge.f32.partialorder %v616_v9, 0.0  ;;  %v810_v13 = vmul.f32 %v1398_v39, %v616_v9 }
  0xcd   : > { %v889_v14 = vsel %vm757_vm8, %v653_v4, %v825_v10  ;;  %v905_v15 = vsel %vm773_vm9, %v693_v5, %v841_v11 }
  0xce   : > { %953 = vst [vmem:[%s1406_s9 + $0x128] sm:$0xff] %v889_v14  ;;  %v858_v16 = vsel %vm726_vm10, %v576_v8, %v794_v12  ;;  %v874_v17 = vsel %vm742_vm11, %v616_v9, %v810_v13 }
  0xcf   : > { %969 = vst [vmem:[%s1406_s9 + $0x1a8] sm:$0xff] %v905_v15 }
  0xd0   : > { %922 = vst [vmem:[%s1406_s9 + $0x30] sm:$0xff] %v858_v16  ;;  %v655_v18 = vpop.f32.mrf.mxu2  ;;  %v695_v19 = vpop.f32.mrf.mxu3 }
  0xd1   : > { %938 = vst [vmem:[%s1406_s9 + $0xb0] sm:$0xff] %v874_v17  ;;  %v656_v20 = vadd.f32 %v1393_v38, %v655_v18  ;;  %v696_v21 = vadd.f32 %v1393_v38, %v695_v19  ;;  %v577_v22 = vpop.f32.mrf.mxu0  ;;  %v617_v23 = vpop.f32.mrf.mxu1 }
  0xd2   : > { %v578_v24 = vadd.f32 %v1393_v38, %v577_v22  ;;  %v618_v25 = vadd.f32 %v1393_v38, %v617_v23 }
  0xd3   : > { %vm758_vm12 = vcmp.ge.f32.partialorder %v656_v20, 0.0  ;;  %v826_v26 = vmul.f32 %v1398_v39, %v656_v20  ;;  %vm774_vm13 = vcmp.ge.f32.partialorder %v696_v21, 0.0  ;;  %v842_v27 = vmul.f32 %v1398_v39, %v696_v21 }
  0xd4   : > { %vm727_vm14 = vcmp.ge.f32.partialorder %v578_v24, 0.0  ;;  %v795_v28 = vmul.f32 %v1398_v39, %v578_v24  ;;  %vm743_vm15 = vcmp.ge.f32.partialorder %v618_v25, 0.0  ;;  %v811_v29 = vmul.f32 %v1398_v39, %v618_v25 }
  0xd5   : > { %v890_v30 = vsel %vm758_vm12, %v656_v20, %v826_v26  ;;  %v906_v31 = vsel %vm774_vm13, %v696_v21, %v842_v27 }
  0xd6   : > { %954 = vst [vmem:[%s1406_s9 + $0x130] sm:$0xff] %v890_v30  ;;  %v859_v32 = vsel %vm727_vm14, %v578_v24, %v795_v28  ;;  %v875_v33 = vsel %vm743_vm15, %v618_v25, %v811_v29 }
  0xd7   : > { %970 = vst [vmem:[%s1406_s9 + $0x1b0] sm:$0xff] %v906_v31 }
  0xd8   : > { %923 = vst [vmem:[%s1406_s9 + $0x38] sm:$0xff] %v859_v32  ;;  %v657_v34 = vpop.f32.mrf.mxu2  ;;  %v697_v35 = vpop.f32.mrf.mxu3 }
  0xd9   : > { %939 = vst [vmem:[%s1406_s9 + $0xb8] sm:$0xff] %v875_v33  ;;  %v658_v36 = vadd.f32 %v1393_v38, %v657_v34  ;;  %v698_v37 = vadd.f32 %v1393_v38, %v697_v35  ;;  %v580_v40 = vpop.f32.mrf.mxu0  ;;  %v620_v41 = vpop.f32.mrf.mxu1 }
  0xda   : > { %v581_v42 = vadd.f32 %v1393_v38, %v580_v40  ;;  %v621_v43 = vadd.f32 %v1393_v38, %v620_v41 }
  0xdb   : > { %vm759_vm0 = vcmp.ge.f32.partialorder %v658_v36, 0.0  ;;  %v827_v44 = vmul.f32 %v1398_v39, %v658_v36  ;;  %vm775_vm1 = vcmp.ge.f32.partialorder %v698_v37, 0.0  ;;  %v843_v45 = vmul.f32 %v1398_v39, %v698_v37 }
  0xdc   : > { %vm728_vm2 = vcmp.ge.f32.partialorder %v581_v42, 0.0  ;;  %v796_v46 = vmul.f32 %v1398_v39, %v581_v42  ;;  %vm744_vm3 = vcmp.ge.f32.partialorder %v621_v43, 0.0  ;;  %v812_v47 = vmul.f32 %v1398_v39, %v621_v43 }
  0xdd   : > { %v891_v48 = vsel %vm759_vm0, %v658_v36, %v827_v44  ;;  %v907_v49 = vsel %vm775_vm1, %v698_v37, %v843_v45 }
  0xde   : > { %955 = vst [vmem:[%s1406_s9 + $0x138] sm:$0xff] %v891_v48  ;;  %v860_v50 = vsel %vm728_vm2, %v581_v42, %v796_v46  ;;  %v876_v51 = vsel %vm744_vm3, %v621_v43, %v812_v47 }
  0xdf   : > { %971 = vst [vmem:[%s1406_s9 + $0x1b8] sm:$0xff] %v907_v49 }
  0xe0   : > { %924 = vst [vmem:[%s1406_s9 + $0x40] sm:$0xff] %v860_v50  ;;  %v660_v52 = vpop.f32.mrf.mxu2  ;;  %v700_v53 = vpop.f32.mrf.mxu3 }
  0xe1   : > { %940 = vst [vmem:[%s1406_s9 + $0xc0] sm:$0xff] %v876_v51  ;;  %v661_v54 = vadd.f32 %v1393_v38, %v660_v52  ;;  %v701_v55 = vadd.f32 %v1393_v38, %v700_v53  ;;  %v582_v56 = vpop.f32.mrf.mxu0  ;;  %v622_v57 = vpop.f32.mrf.mxu1 }
  0xe2   : > { %v583_v58 = vadd.f32 %v1393_v38, %v582_v56  ;;  %v623_v59 = vadd.f32 %v1393_v38, %v622_v57 }
  0xe3   : > { %vm760_vm4 = vcmp.ge.f32.partialorder %v661_v54, 0.0  ;;  %v828_v60 = vmul.f32 %v1398_v39, %v661_v54  ;;  %vm776_vm5 = vcmp.ge.f32.partialorder %v701_v55, 0.0  ;;  %v844_v61 = vmul.f32 %v1398_v39, %v701_v55 }
  0xe4   : > { %vm729_vm6 = vcmp.ge.f32.partialorder %v583_v58, 0.0  ;;  %v797_v62 = vmul.f32 %v1398_v39, %v583_v58  ;;  %vm745_vm7 = vcmp.ge.f32.partialorder %v623_v59, 0.0  ;;  %v813_v63 = vmul.f32 %v1398_v39, %v623_v59 }
  0xe5   : > { %v892_v0 = vsel %vm760_vm4, %v661_v54, %v828_v60  ;;  %v908_v1 = vsel %vm776_vm5, %v701_v55, %v844_v61 }
  0xe6   : > { %956 = vst [vmem:[%s1406_s9 + $0x140] sm:$0xff] %v892_v0  ;;  %v861_v2 = vsel %vm729_vm6, %v583_v58, %v797_v62  ;;  %v877_v3 = vsel %vm745_vm7, %v623_v59, %v813_v63 }
  0xe7   : > { %972 = vst [vmem:[%s1406_s9 + $0x1c0] sm:$0xff] %v908_v1 }
  0xe8   : > { %925 = vst [vmem:[%s1406_s9 + $0x48] sm:$0xff] %v861_v2  ;;  %v662_v4 = vpop.f32.mrf.mxu2  ;;  %v702_v5 = vpop.f32.mrf.mxu3 }
  0xe9   : > { %941 = vst [vmem:[%s1406_s9 + $0xc8] sm:$0xff] %v877_v3  ;;  %v663_v6 = vadd.f32 %v1393_v38, %v662_v4  ;;  %v703_v7 = vadd.f32 %v1393_v38, %v702_v5  ;;  %v585_v8 = vpop.f32.mrf.mxu0  ;;  %v625_v9 = vpop.f32.mrf.mxu1 }
  0xea   : > { %v586_v10 = vadd.f32 %v1393_v38, %v585_v8  ;;  %v626_v11 = vadd.f32 %v1393_v38, %v625_v9 }
  0xeb   : > { %vm761_vm8 = vcmp.ge.f32.partialorder %v663_v6, 0.0  ;;  %v829_v12 = vmul.f32 %v1398_v39, %v663_v6  ;;  %vm777_vm9 = vcmp.ge.f32.partialorder %v703_v7, 0.0  ;;  %v845_v13 = vmul.f32 %v1398_v39, %v703_v7 }
  0xec   : > { %vm730_vm10 = vcmp.ge.f32.partialorder %v586_v10, 0.0  ;;  %v798_v14 = vmul.f32 %v1398_v39, %v586_v10  ;;  %vm746_vm11 = vcmp.ge.f32.partialorder %v626_v11, 0.0  ;;  %v814_v15 = vmul.f32 %v1398_v39, %v626_v11 }
  0xed   : > { %v893_v16 = vsel %vm761_vm8, %v663_v6, %v829_v12  ;;  %v909_v17 = vsel %vm777_vm9, %v703_v7, %v845_v13 }
  0xee   : > { %957 = vst [vmem:[%s1406_s9 + $0x148] sm:$0xff] %v893_v16  ;;  %v862_v18 = vsel %vm730_vm10, %v586_v10, %v798_v14  ;;  %v878_v19 = vsel %vm746_vm11, %v626_v11, %v814_v15 }
  0xef   : > { %973 = vst [vmem:[%s1406_s9 + $0x1c8] sm:$0xff] %v909_v17 }
  0xf0   : > { %926 = vst [vmem:[%s1406_s9 + $0x50] sm:$0xff] %v862_v18  ;;  %v665_v20 = vpop.f32.mrf.mxu2  ;;  %v705_v21 = vpop.f32.mrf.mxu3 }
  0xf1   : > { %942 = vst [vmem:[%s1406_s9 + $0xd0] sm:$0xff] %v878_v19  ;;  %v666_v22 = vadd.f32 %v1393_v38, %v665_v20  ;;  %v706_v23 = vadd.f32 %v1393_v38, %v705_v21  ;;  %v587_v24 = vpop.f32.mrf.mxu0  ;;  %v627_v25 = vpop.f32.mrf.mxu1 }
  0xf2   : > { %v588_v26 = vadd.f32 %v1393_v38, %v587_v24  ;;  %v628_v27 = vadd.f32 %v1393_v38, %v627_v25 }
  0xf3   : > { %vm762_vm12 = vcmp.ge.f32.partialorder %v666_v22, 0.0  ;;  %v830_v28 = vmul.f32 %v1398_v39, %v666_v22  ;;  %vm778_vm13 = vcmp.ge.f32.partialorder %v706_v23, 0.0  ;;  %v846_v29 = vmul.f32 %v1398_v39, %v706_v23 }
  0xf4   : > { %vm731_vm14 = vcmp.ge.f32.partialorder %v588_v26, 0.0  ;;  %v799_v30 = vmul.f32 %v1398_v39, %v588_v26  ;;  %vm747_vm15 = vcmp.ge.f32.partialorder %v628_v27, 0.0  ;;  %v815_v31 = vmul.f32 %v1398_v39, %v628_v27 }
  0xf5   : > { %v894_v32 = vsel %vm762_vm12, %v666_v22, %v830_v28  ;;  %v910_v33 = vsel %vm778_vm13, %v706_v23, %v846_v29 }
  0xf6   : > { %958 = vst [vmem:[%s1406_s9 + $0x150] sm:$0xff] %v894_v32  ;;  %v863_v34 = vsel %vm731_vm14, %v588_v26, %v799_v30  ;;  %v879_v35 = vsel %vm747_vm15, %v628_v27, %v815_v31 }
  0xf7   : > { %974 = vst [vmem:[%s1406_s9 + $0x1d0] sm:$0xff] %v910_v33 }
  0xf8   : > { %927 = vst [vmem:[%s1406_s9 + $0x58] sm:$0xff] %v863_v34  ;;  %v667_v36 = vpop.f32.mrf.mxu2  ;;  %v707_v37 = vpop.f32.mrf.mxu3 }
  0xf9   : > { %943 = vst [vmem:[%s1406_s9 + $0xd8] sm:$0xff] %v879_v35  ;;  %v668_v40 = vadd.f32 %v1393_v38, %v667_v36  ;;  %v708_v41 = vadd.f32 %v1393_v38, %v707_v37  ;;  %v590_v42 = vpop.f32.mrf.mxu0  ;;  %v630_v43 = vpop.f32.mrf.mxu1 }
  0xfa   : > { %v591_v44 = vadd.f32 %v1393_v38, %v590_v42  ;;  %v631_v45 = vadd.f32 %v1393_v38, %v630_v43 }
  0xfb   : > { %vm763_vm0 = vcmp.ge.f32.partialorder %v668_v40, 0.0  ;;  %v831_v46 = vmul.f32 %v1398_v39, %v668_v40  ;;  %vm779_vm1 = vcmp.ge.f32.partialorder %v708_v41, 0.0  ;;  %v847_v47 = vmul.f32 %v1398_v39, %v708_v41 }
  0xfc   : > { %vm732_vm2 = vcmp.ge.f32.partialorder %v591_v44, 0.0  ;;  %v800_v48 = vmul.f32 %v1398_v39, %v591_v44  ;;  %vm748_vm3 = vcmp.ge.f32.partialorder %v631_v45, 0.0  ;;  %v816_v49 = vmul.f32 %v1398_v39, %v631_v45 }
  0xfd   : > { %v895_v50 = vsel %vm763_vm0, %v668_v40, %v831_v46  ;;  %v911_v51 = vsel %vm779_vm1, %v708_v41, %v847_v47 }
  0xfe   : > { %959 = vst [vmem:[%s1406_s9 + $0x158] sm:$0xff] %v895_v50  ;;  %v864_v52 = vsel %vm732_vm2, %v591_v44, %v800_v48  ;;  %v880_v53 = vsel %vm748_vm3, %v631_v45, %v816_v49 }
  0xff   : > { %975 = vst [vmem:[%s1406_s9 + $0x1d8] sm:$0xff] %v911_v51 }
 0x100   : > { %928 = vst [vmem:[%s1406_s9 + $0x60] sm:$0xff] %v864_v52  ;;  %v670_v54 = vpop.f32.mrf.mxu2  ;;  %v710_v55 = vpop.f32.mrf.mxu3 }
 0x101   : > { %944 = vst [vmem:[%s1406_s9 + $0xe0] sm:$0xff] %v880_v53  ;;  %v671_v56 = vadd.f32 %v1393_v38, %v670_v54  ;;  %v711_v57 = vadd.f32 %v1393_v38, %v710_v55  ;;  %v592_v58 = vpop.f32.mrf.mxu0  ;;  %v632_v59 = vpop.f32.mrf.mxu1 }
 0x102   : > { %v593_v60 = vadd.f32 %v1393_v38, %v592_v58  ;;  %v633_v61 = vadd.f32 %v1393_v38, %v632_v59 }
 0x103   : > { %vm764_vm4 = vcmp.ge.f32.partialorder %v671_v56, 0.0  ;;  %v832_v62 = vmul.f32 %v1398_v39, %v671_v56  ;;  %vm780_vm5 = vcmp.ge.f32.partialorder %v711_v57, 0.0  ;;  %v848_v63 = vmul.f32 %v1398_v39, %v711_v57 }
 0x104   : > { %vm733_vm6 = vcmp.ge.f32.partialorder %v593_v60, 0.0  ;;  %v801_v0 = vmul.f32 %v1398_v39, %v593_v60  ;;  %vm749_vm7 = vcmp.ge.f32.partialorder %v633_v61, 0.0  ;;  %v817_v1 = vmul.f32 %v1398_v39, %v633_v61 }
 0x105   : > { %v896_v2 = vsel %vm764_vm4, %v671_v56, %v832_v62  ;;  %v912_v3 = vsel %vm780_vm5, %v711_v57, %v848_v63 }
 0x106   : > { %960 = vst [vmem:[%s1406_s9 + $0x160] sm:$0xff] %v896_v2  ;;  %v865_v4 = vsel %vm733_vm6, %v593_v60, %v801_v0  ;;  %v881_v5 = vsel %vm749_vm7, %v633_v61, %v817_v1 }
 0x107   : > { %976 = vst [vmem:[%s1406_s9 + $0x1e0] sm:$0xff] %v912_v3 }
 0x108   : > { %929 = vst [vmem:[%s1406_s9 + $0x68] sm:$0xff] %v865_v4  ;;  %v672_v6 = vpop.f32.mrf.mxu2  ;;  %v712_v7 = vpop.f32.mrf.mxu3 }
 0x109   : > { %945 = vst [vmem:[%s1406_s9 + $0xe8] sm:$0xff] %v881_v5  ;;  %v673_v8 = vadd.f32 %v1393_v38, %v672_v6  ;;  %v713_v9 = vadd.f32 %v1393_v38, %v712_v7  ;;  %v595_v10 = vpop.f32.mrf.mxu0  ;;  %v635_v11 = vpop.f32.mrf.mxu1 }
 0x10a   : > { %v596_v12 = vadd.f32 %v1393_v38, %v595_v10  ;;  %v636_v13 = vadd.f32 %v1393_v38, %v635_v11 }
 0x10b   : > { %vm765_vm8 = vcmp.ge.f32.partialorder %v673_v8, 0.0  ;;  %v833_v14 = vmul.f32 %v1398_v39, %v673_v8  ;;  %vm781_vm9 = vcmp.ge.f32.partialorder %v713_v9, 0.0  ;;  %v849_v15 = vmul.f32 %v1398_v39, %v713_v9 }
 0x10c   : > { %vm734_vm10 = vcmp.ge.f32.partialorder %v596_v12, 0.0  ;;  %v802_v16 = vmul.f32 %v1398_v39, %v596_v12  ;;  %vm750_vm11 = vcmp.ge.f32.partialorder %v636_v13, 0.0  ;;  %v818_v17 = vmul.f32 %v1398_v39, %v636_v13 }
 0x10d   : > { %v897_v18 = vsel %vm765_vm8, %v673_v8, %v833_v14  ;;  %v913_v19 = vsel %vm781_vm9, %v713_v9, %v849_v15 }
 0x10e   : > { %961 = vst [vmem:[%s1406_s9 + $0x168] sm:$0xff] %v897_v18  ;;  %v866_v20 = vsel %vm734_vm10, %v596_v12, %v802_v16  ;;  %v882_v21 = vsel %vm750_vm11, %v636_v13, %v818_v17 }
 0x10f   : > { %977 = vst [vmem:[%s1406_s9 + $0x1e8] sm:$0xff] %v913_v19 }
 0x110   : > { %930 = vst [vmem:[%s1406_s9 + $0x70] sm:$0xff] %v866_v20  ;;  %v675_v22 = vpop.f32.mrf.mxu2  ;;  %v715_v23 = vpop.f32.mrf.mxu3 }
 0x111   : > { %946 = vst [vmem:[%s1406_s9 + $0xf0] sm:$0xff] %v882_v21  ;;  %v676_v24 = vadd.f32 %v1393_v38, %v675_v22  ;;  %v716_v25 = vadd.f32 %v1393_v38, %v715_v23  ;;  %v597_v26 = vpop.f32.mrf.mxu0  ;;  %v637_v27 = vpop.f32.mrf.mxu1 }
 0x112   : > { %v598_v28 = vadd.f32 %v1393_v38, %v597_v26  ;;  %v638_v29 = vadd.f32 %v1393_v38, %v637_v27 }
 0x113   : > { %vm766_vm12 = vcmp.ge.f32.partialorder %v676_v24, 0.0  ;;  %v834_v30 = vmul.f32 %v1398_v39, %v676_v24  ;;  %vm782_vm13 = vcmp.ge.f32.partialorder %v716_v25, 0.0  ;;  %v850_v31 = vmul.f32 %v1398_v39, %v716_v25 }
 0x114   : > { %vm735_vm14 = vcmp.ge.f32.partialorder %v598_v28, 0.0  ;;  %v803_v32 = vmul.f32 %v1398_v39, %v598_v28  ;;  %vm751_vm15 = vcmp.ge.f32.partialorder %v638_v29, 0.0  ;;  %v819_v33 = vmul.f32 %v1398_v39, %v638_v29 }
 0x115   : > { %v898_v34 = vsel %vm766_vm12, %v676_v24, %v834_v30  ;;  %v914_v35 = vsel %vm782_vm13, %v716_v25, %v850_v31 }
 0x116   : > { %962 = vst [vmem:[%s1406_s9 + $0x170] sm:$0xff] %v898_v34  ;;  %v867_v36 = vsel %vm735_vm14, %v598_v28, %v803_v32  ;;  %v883_v37 = vsel %vm751_vm15, %v638_v29, %v819_v33 }
 0x117   : > { %978 = vst [vmem:[%s1406_s9 + $0x1f0] sm:$0xff] %v914_v35 }
 0x118   : > { %931 = vst [vmem:[%s1406_s9 + $0x78] sm:$0xff] %v867_v36  ;;  %v677_v40 = vpop.f32.mrf.mxu2  ;;  %v717_v41 = vpop.f32.mrf.mxu3 }
 0x119   : > { %947 = vst [vmem:[%s1406_s9 + $0xf8] sm:$0xff] %v883_v37  ;;  %v678_v42 = vadd.f32 %v1393_v38, %v677_v40  ;;  %v718_v43 = vadd.f32 %v1393_v38, %v717_v41 }
 0x11b   : > { %vm767_vm0 = vcmp.ge.f32.partialorder %v678_v42, 0.0  ;;  %v835_v44 = vmul.f32 %v1398_v39, %v678_v42  ;;  %vm783_vm1 = vcmp.ge.f32.partialorder %v718_v43, 0.0  ;;  %v851_v45 = vmul.f32 %v1398_v39, %v718_v43 }
 0x11d   : > { %v899_v46 = vsel %vm767_vm0, %v678_v42, %v835_v44  ;;  %v915_v47 = vsel %vm783_vm1, %v718_v43, %v851_v45 }
 0x11e   : > { %963 = vst [vmem:[%s1406_s9 + $0x178] sm:$0xff] %v899_v46 }
 0x11f   : > { %979 = vst [vmem:[%s1406_s9 + $0x1f8] sm:$0xff] %v915_v47 }
 0x120 PF: > { %s14_s15 = sadd.s32 1, %s1274_s15  }
 0x121   : > { %p11_p4 = scmp.ge.s32.totalorder %s14_s15, 6  }
 0x123   :  { %13 = sbr.rel (!%p11_p4) target bundleno = 1 (0x1), region = 66 }

// kernel: up2_forward.4
= control target key start
LH: loop header
LB: loop body
LE: loop exit
PB: predicated region body
PF: predicated region fallthrough
CT: control target
= control target key end

     0   :  { %s1848_s15 = smov 0   ;;  %s2362_s0 = inlined_call_operand.vmem [shape: bf16[2048,144], index: 0, kind: input, shape index: {}]   ;;  %s2363_s1 = inlined_call_operand.vmem [shape: bf16[144,128], index: 1, kind: input, shape index: {}]   ;;  %s2364_s2 = inlined_call_operand.vmem [shape: f32[1,128], index: 2, kind: input, shape index: {}]   ;;  %s2365_s3 = inlined_call_operand.vmem [shape: f32[1,128], index: 3, kind: input, shape index: {}]   ;;  %s2366_s4 = inlined_call_operand.vmem [shape: f32[2048,128], index: 4, kind: output, shape index: {}]  }
   0x1 LB: > { %s1384_s16 = sadd.s32 4294967295, %s1821_s15   ;;  %p1388_p0 = scmp.ge.s32.totalorder %s1821_s15, 1  ;;  %s1821_s15 = sphi %s1848_s15, %s14_s15  }
   0x2   : > { %p164_p1 = scmp.lt.s32.totalorder %s1821_s15, 5 }
   0x4   : > { %p165_p2 = pnand %p1388_p0, %p164_p1 }
   0x5   : > { %s1389_s21 = sshll.u32 (!%p165_p2), %s1384_s16, 6 }
   0x6   : > { %168 = sbr.rel (%p165_p2) target bundleno = 431 (0x1af), region = 36  ;;  %p192_p3 = scmp.lt.s32.totalorder (!%p165_p2), %s1389_s21, 255 }
   0xb   : > { %v1792_v0 = vld [vmem:[%s2363_s1 + $0x38] sm:$0xff]  ;;  %v1793_v1 = vld [vmem:[%s2363_s1 + $0x40] sm:$0xff]  ;;  %v1791_v2 = vld [vmem:[%s2363_s1 + $0x30] sm:$0xff]  ;;  %s2368_s21 = smov (!%p192_p3, %s1389_s21), 255  ;;  %vm633_vm0 = vcmask 130048  }
   0xc   : > { %730 = vmatpush.bf16.msra.mxu0 %v1792_v0  ;;  %1794 = vmatpush.bf16.msra.mxu2 %v1792_v0  ;;  %s1720_s24 = sshll.u32 %s2368_s21, 3  ;;  %v1790_v3 = vld [vmem:[%s2363_s1 + $0x28] sm:$0xff]  ;;  %v1789_v7 = vld [vmem:[%s2363_s1 + $0x20] sm:$0xff]  ;;  %v1788_v11 = vld [vmem:[%s2363_s1 + $0x18] sm:$0xff] }
   0xd   : > { %906 = vmatpush.bf16.msra.mxu1 %v1793_v1  ;;  %1802 = vmatpush.bf16.msra.mxu3 %v1793_v1  ;;  %s1873_s27 = scalar_lea.vmem %s2362_s0, %s1720_s24  ;;  %v1787_v12 = vld [vmem:[%s2363_s1 + $0x10] sm:$0xff]  ;;  %v1786_v16 = vld [vmem:[%s2363_s1 + $0x8] sm:$0xff]  ;;  %v1785_v19 = vld [vmem:[%s2363_s1] sm:$0xff]  ;;  %s2011_s22 = scalar_lea.vmem %s2366_s4, %s1720_s24 }
   0xe   : > { %v1721_v4 = vld [vmem:[%s1873_s27 + $0x4] sm:$0xf]  ;;  %v1398_v5 = vld [vmem:[%s1873_s27 + $0x8] sm:$0xf0]  ;;  %v1755_v8 = vld [vmem:[%s1873_s27 + $0x114] sm:$0xf] }
   0xf   : > { %v1401_v6 = vor.u32 %v1721_v4, %v1398_v5  ;;  %v1534_v9 = vld [vmem:[%s1873_s27 + $0x118] sm:$0xf0]  ;;  %v1723_v13 = vld [vmem:[%s1873_s27 + $0x14] sm:$0xf]  ;;  %v1757_v17 = vld [vmem:[%s1873_s27 + $0x124] sm:$0xf] }
  0x10   : > { %731 = vmatpush.bf16.msra.mxu0 %v1791_v2  ;;  %1795 = vmatpush.bf16.msra.mxu2 %v1791_v2  ;;  %v1537_v10 = vor.u32 %v1755_v8, %v1534_v9  ;;  %v1406_v14 = vld [vmem:[%s1873_s27 + $0x18] sm:$0xf0]  ;;  %v1542_v18 = vld [vmem:[%s1873_s27 + $0x128] sm:$0xf0]  ;;  %v1396_v20 = vld [vmem:[%s1873_s27] sm:$0xf] }
  0x11   : > { %1686 = vmatmul.msk.bf16.vlgmr.msra.gmra.mxu1 %vm633_vm0, %v1401_v6  ;;  %v1409_v15 = vor.u32 %v1723_v13, %v1406_v14  ;;  %v1722_v21 = vld [vmem:[%s1873_s27 + $0x4] sm:$0xf0]  ;;  %v1545_v22 = vor.u32 %v1757_v17, %v1542_v18  ;;  %v1524_v23 = vld [vmem:[%s1873_s27 + $0x100] sm:$0xf]  ;;  %v1725_v27 = vld [vmem:[%s1873_s27 + $0x24] sm:$0xf] }
  0x12   : > { %1703 = vmatmul.msk.bf16.vlgmr.msra.gmra.mxu3 %vm633_vm0, %v1537_v10  ;;  %v1754_v24 = vld [vmem:[%s1873_s27 + $0x104] sm:$0xf0]  ;;  %v1397_v25 = vor.u32 %v1722_v21, %v1396_v20  ;;  %v1414_v28 = vld [vmem:[%s1873_s27 + $0x28] sm:$0xf0]  ;;  %v1759_v30 = vld [vmem:[%s1873_s27 + $0x134] sm:$0xf] }
  0x13   : > { %v1525_v26 = vor.u32 %v1754_v24, %v1524_v23  ;;  %v1417_v29 = vor.u32 %v1725_v27, %v1414_v28  ;;  %v1550_v31 = vld [vmem:[%s1873_s27 + $0x138] sm:$0xf0]  ;;  %v1404_v32 = vld [vmem:[%s1873_s27 + $0x10] sm:$0xf]  ;;  %v1724_v33 = vld [vmem:[%s1873_s27 + $0x14] sm:$0xf0] }
  0x14   : > { %732 = vmatpush.bf16.msra.mxu0 %v1790_v3  ;;  %1796 = vmatpush.bf16.msra.mxu2 %v1790_v3  ;;  %v1553_v34 = vor.u32 %v1759_v30, %v1550_v31  ;;  %v1532_v35 = vld [vmem:[%s1873_s27 + $0x110] sm:$0xf]  ;;  %v1756_v36 = vld [vmem:[%s1873_s27 + $0x114] sm:$0xf0]  ;;  %v1405_v37 = vor.u32 %v1724_v33, %v1404_v32  ;;  %v1727_v39 = vld [vmem:[%s1873_s27 + $0x34] sm:$0xf] }
  0x15   : > { %v1533_v38 = vor.u32 %v1756_v36, %v1532_v35  ;;  %v1422_v40 = vld [vmem:[%s1873_s27 + $0x38] sm:$0xf0]  ;;  %v1761_v42 = vld [vmem:[%s1873_s27 + $0x144] sm:$0xf]  ;;  %v1558_v43 = vld [vmem:[%s1873_s27 + $0x148] sm:$0xf0] }
  0x16   : > { %v1425_v41 = vor.u32 %v1727_v39, %v1422_v40  ;;  %v1412_v44 = vld [vmem:[%s1873_s27 + $0x20] sm:$0xf]  ;;  %v1726_v45 = vld [vmem:[%s1873_s27 + $0x24] sm:$0xf0]  ;;  %v1561_v46 = vor.u32 %v1761_v42, %v1558_v43  ;;  %v1729_v51 = vld [vmem:[%s1873_s27 + $0x44] sm:$0xf] }
  0x17   : > { %v1540_v47 = vld [vmem:[%s1873_s27 + $0x120] sm:$0xf]  ;;  %v1758_v48 = vld [vmem:[%s1873_s27 + $0x124] sm:$0xf0]  ;;  %v1413_v49 = vor.u32 %v1726_v45, %v1412_v44  ;;  %v1430_v52 = vld [vmem:[%s1873_s27 + $0x48] sm:$0xf0] }
  0x18   : > { %733 = vmatpush.bf16.msra.mxu0 %v1789_v7  ;;  %1797 = vmatpush.bf16.msra.mxu2 %v1789_v7  ;;  %v1541_v50 = vor.u32 %v1758_v48, %v1540_v47  ;;  %v1433_v53 = vor.u32 %v1729_v51, %v1430_v52  ;;  %v1763_v54 = vld [vmem:[%s1873_s27 + $0x154] sm:$0xf]  ;;  %v1566_v55 = vld [vmem:[%s1873_s27 + $0x158] sm:$0xf0]  ;;  %v1420_v56 = vld [vmem:[%s1873_s27 + $0x30] sm:$0xf] }
  0x19   : > { %v1728_v57 = vld [vmem:[%s1873_s27 + $0x34] sm:$0xf0]  ;;  %v1569_v58 = vor.u32 %v1763_v54, %v1566_v55  ;;  %v1548_v59 = vld [vmem:[%s1873_s27 + $0x130] sm:$0xf]  ;;  %v1731_v63 = vld [vmem:[%s1873_s27 + $0x54] sm:$0xf] }
  0x1a   : > { %v1760_v60 = vld [vmem:[%s1873_s27 + $0x134] sm:$0xf0]  ;;  %v1421_v61 = vor.u32 %v1728_v57, %v1420_v56  ;;  %v1438_v0 = vld [vmem:[%s1873_s27 + $0x58] sm:$0xf0]  ;;  %v1765_v2 = vld [vmem:[%s1873_s27 + $0x164] sm:$0xf] }
  0x1b   : > { %v1549_v62 = vor.u32 %v1760_v60, %v1548_v59  ;;  %v1441_v1 = vor.u32 %v1731_v63, %v1438_v0  ;;  %v1574_v3 = vld [vmem:[%s1873_s27 + $0x168] sm:$0xf0]  ;;  %v1428_v4 = vld [vmem:[%s1873_s27 + $0x40] sm:$0xf]  ;;  %v1730_v5 = vld [vmem:[%s1873_s27 + $0x44] sm:$0xf0] }
  0x1c   : > { %734 = vmatpush.bf16.msra.mxu0 %v1788_v11  ;;  %1798 = vmatpush.bf16.msra.mxu2 %v1788_v11  ;;  %v1577_v6 = vor.u32 %v1765_v2, %v1574_v3  ;;  %v1556_v7 = vld [vmem:[%s1873_s27 + $0x140] sm:$0xf]  ;;  %v1762_v8 = vld [vmem:[%s1873_s27 + $0x144] sm:$0xf0]  ;;  %v1429_v9 = vor.u32 %v1730_v5, %v1428_v4  ;;  %v1733_v11 = vld [vmem:[%s1873_s27 + $0x64] sm:$0xf] }
  0x1d   : > { %v1557_v10 = vor.u32 %v1762_v8, %v1556_v7  ;;  %v1767_v14 = vld [vmem:[%s1873_s27 + $0x174] sm:$0xf]  ;;  %v1732_v17 = vld [vmem:[%s1873_s27 + $0x54] sm:$0xf0]  ;;  %v1454_v24 = vld [vmem:[%s1873_s27 + $0x78] sm:$0xf0] }
  0x1e   : > { %v1764_v20 = vld [vmem:[%s1873_s27 + $0x154] sm:$0xf0]  ;;  %v1735_v23 = vld [vmem:[%s1873_s27 + $0x74] sm:$0xf]  ;;  %v1590_v27 = vld [vmem:[%s1873_s27 + $0x188] sm:$0xf0] }
  0x1f   : > { %v1444_v28 = vld [vmem:[%s1873_s27 + $0x60] sm:$0xf]  ;;  %v1766_v32 = vld [vmem:[%s1873_s27 + $0x164] sm:$0xf0]  ;;  %v1737_v35 = vld [vmem:[%s1873_s27 + $0x84] sm:$0xf] }
  0x20   : > { %735 = vmatpush.bf16.msra.mxu0 %v1787_v12  ;;  %1799 = vmatpush.bf16.msra.mxu2 %v1787_v12  ;;  %v1446_v12 = vld [vmem:[%s1873_s27 + $0x68] sm:$0xf0]  ;;  %v1572_v31 = vld [vmem:[%s1873_s27 + $0x160] sm:$0xf]  ;;  %v1771_v39 = vld [vmem:[%s1873_s27 + $0x194] sm:$0xf] }
  0x21   : > { %1687 = vmatmul.msk.bf16.gmra.mxu1 %vm633_vm0, %v1409_v15  ;;  %v1449_v13 = vor.u32 %v1733_v11, %v1446_v12  ;;  %v1582_v15 = vld [vmem:[%s1873_s27 + $0x178] sm:$0xf0]  ;;  %v1462_v36 = vld [vmem:[%s1873_s27 + $0x88] sm:$0xf0]  ;;  %v1736_v42 = vld [vmem:[%s1873_s27 + $0x74] sm:$0xf0] }
  0x22   : > { %1704 = vmatmul.msk.bf16.gmra.mxu3 %vm633_vm0, %v1545_v22  ;;  %v1585_v18 = vor.u32 %v1767_v14, %v1582_v15  ;;  %v1598_v40 = vld [vmem:[%s1873_s27 + $0x198] sm:$0xf0]  ;;  %v1580_v44 = vld [vmem:[%s1873_s27 + $0x170] sm:$0xf]  ;;  %v1768_v45 = vld [vmem:[%s1873_s27 + $0x174] sm:$0xf0] }
  0x23   : > { %v1601_v43 = vor.u32 %v1771_v39, %v1598_v40  ;;  %v1581_v47 = vor.u32 %v1768_v45, %v1580_v44  ;;  %v1470_v51 = vld [vmem:[%s1873_s27 + $0x98] sm:$0xf0]  ;;  %v1773_v55 = vld [vmem:[%s1873_s27 + $0x1a4] sm:$0xf]  ;;  %v1606_v56 = vld [vmem:[%s1873_s27 + $0x1a8] sm:$0xf0] }
  0x24   : > { %736 = vmatpush.bf16.msra.mxu0 %v1786_v16  ;;  %1800 = vmatpush.bf16.msra.mxu2 %v1786_v16  ;;  %v1436_v16 = vld [vmem:[%s1873_s27 + $0x50] sm:$0xf]  ;;  %v1460_v57 = vld [vmem:[%s1873_s27 + $0x80] sm:$0xf]  ;;  %v1609_v59 = vor.u32 %v1773_v55, %v1606_v56  ;;  %v1741_v8 = vld [vmem:[%s1873_s27 + $0xa4] sm:$0xf] }
  0x25   : > { %v1437_v21 = vor.u32 %v1732_v17, %v1436_v16  ;;  %v1993_v60 = vld [vmem:[%s2364_s2] ss:$0 sm:$0xff] }
  0x26   : > { %v2002_v3 = vld [vmem:[%s2365_s3] ss:$0 sm:$0xff] }
  0x28   : > { %737 = vmatpush.bf16.msra.mxu0 %v1785_v19  ;;  %1801 = vmatpush.bf16.msra.mxu2 %v1785_v19  ;;  %v1564_v19 = vld [vmem:[%s1873_s27 + $0x150] sm:$0xf] }
  0x29   : > { %v1565_v22 = vor.u32 %v1764_v20, %v1564_v19  ;;  %v1614_v19 = vld [vmem:[%s1873_s27 + $0x1b8] sm:$0xf0]  ;;  %v1468_v20 = vld [vmem:[%s1873_s27 + $0x90] sm:$0xf] }
  0x2b   : > { %738 = vmatmul.bf16.vlgmr.msra.gmra.mxu0 %v1397_v25  ;;  %818 = vmatmul.bf16.vlgmr.msra.gmra.mxu2 %v1525_v26  ;;  %v1457_v25 = vor.u32 %v1735_v23, %v1454_v24  ;;  %v1769_v26 = vld [vmem:[%s1873_s27 + $0x184] sm:$0xf]  ;;  %v1596_v24 = vld [vmem:[%s1873_s27 + $0x190] sm:$0xf] }
  0x2c   : > { %v1593_v30 = vor.u32 %v1769_v26, %v1590_v27 }
  0x31   : > { %1688 = vmatmul.msk.bf16.gmra.mxu1 %vm633_vm0, %v1417_v29  ;;  %v1734_v29 = vld [vmem:[%s1873_s27 + $0x64] sm:$0xf0] }
  0x32   : > { %1705 = vmatmul.msk.bf16.gmra.mxu3 %vm633_vm0, %v1553_v34  ;;  %v1445_v33 = vor.u32 %v1734_v29, %v1444_v28  ;;  %v1573_v34 = vor.u32 %v1766_v32, %v1572_v31 }
  0x3b   : > { %743 = vmatmul.bf16.gmra.mxu0 %v1405_v37  ;;  %823 = vmatmul.bf16.gmra.mxu2 %v1533_v38  ;;  %v1465_v37 = vor.u32 %v1737_v35, %v1462_v36  ;;  %v1743_v36 = vld [vmem:[%s1873_s27 + $0xb4] sm:$0xf] }
  0x41   : > { %1689 = vmatmul.msk.bf16.gmra.mxu1 %vm633_vm0, %v1425_v41  ;;  %v1452_v41 = vld [vmem:[%s1873_s27 + $0x70] sm:$0xf] }
  0x42   : > { %1706 = vmatmul.msk.bf16.gmra.mxu3 %vm633_vm0, %v1561_v46  ;;  %v1453_v46 = vor.u32 %v1736_v42, %v1452_v41 }
  0x4b   : > { %748 = vmatmul.bf16.gmra.mxu0 %v1413_v49  ;;  %828 = vmatmul.bf16.gmra.mxu2 %v1541_v50  ;;  %v1739_v50 = vld [vmem:[%s1873_s27 + $0x94] sm:$0xf] }
  0x4c   : > { %v1473_v52 = vor.u32 %v1739_v50, %v1470_v51  ;;  %v1622_v50 = vld [vmem:[%s1873_s27 + $0x1c8] sm:$0xf0] }
  0x51   : > { %1690 = vmatmul.msk.bf16.gmra.mxu1 %vm633_vm0, %v1433_v53 }
  0x52   : > { %1707 = vmatmul.msk.bf16.gmra.mxu3 %vm633_vm0, %v1569_v58  ;;  %v1738_v58 = vld [vmem:[%s1873_s27 + $0x84] sm:$0xf0] }
  0x53   : > { %v1461_v63 = vor.u32 %v1738_v58, %v1460_v57  ;;  %v1604_v57 = vld [vmem:[%s1873_s27 + $0x1a0] sm:$0xf] }
  0x5b   : > { %753 = vmatmul.bf16.gmra.mxu0 %v1421_v61  ;;  %833 = vmatmul.bf16.gmra.mxu2 %v1549_v62  ;;  %v1588_v61 = vld [vmem:[%s1873_s27 + $0x180] sm:$0xf]  ;;  %v1770_v62 = vld [vmem:[%s1873_s27 + $0x184] sm:$0xf0] }
  0x61   : > { %1691 = vmatmul.msk.bf16.gmra.mxu1 %vm633_vm0, %v1441_v1  ;;  %v1589_v1 = vor.u32 %v1770_v62, %v1588_v61 }
  0x62   : > { %1708 = vmatmul.msk.bf16.gmra.mxu3 %vm633_vm0, %v1577_v6 }
  0x6b   : > { %758 = vmatmul.bf16.gmra.mxu0 %v1429_v9  ;;  %838 = vmatmul.bf16.gmra.mxu2 %v1557_v10  ;;  %v1478_v9 = vld [vmem:[%s1873_s27 + $0xa8] sm:$0xf0] }
  0x71   : > { %1692 = vmatmul.msk.bf16.gmra.mxu1 %vm633_vm0, %v1449_v13  ;;  %v1481_v13 = vor.u32 %v1741_v8, %v1478_v9 }
  0x72   : > { %1709 = vmatmul.msk.bf16.gmra.mxu3 %vm633_vm0, %v1585_v18  ;;  %v1775_v18 = vld [vmem:[%s1873_s27 + $0x1b4] sm:$0xf] }
  0x7b   : > { %763 = vmatmul.bf16.gmra.mxu0 %v1437_v21  ;;  %843 = vmatmul.bf16.gmra.mxu2 %v1565_v22  ;;  %v1740_v21 = vld [vmem:[%s1873_s27 + $0x94] sm:$0xf0]  ;;  %v1617_v22 = vor.u32 %v1775_v18, %v1614_v19 }
  0x7c   : > { %v1469_v28 = vor.u32 %v1740_v21, %v1468_v20 }
  0x81   : > { %1693 = vmatmul.msk.bf16.gmra.mxu1 %vm633_vm0, %v1457_v25  ;;  %v1772_v25 = vld [vmem:[%s1873_s27 + $0x194] sm:$0xf0] }
  0x82   : > { %1710 = vmatmul.msk.bf16.gmra.mxu3 %vm633_vm0, %v1593_v30  ;;  %v1597_v30 = vor.u32 %v1772_v25, %v1596_v24  ;;  %v1779_v25 = vld [vmem:[%s1873_s27 + $0x1d4] sm:$0xf] }
  0x8b   : > { %768 = vmatmul.bf16.gmra.mxu0 %v1445_v33  ;;  %848 = vmatmul.bf16.gmra.mxu2 %v1573_v34 }
  0x8e   : > { %v908_v38 = vpop.f32.mrf.mxu1 }
  0x91   : > { %1694 = vmatmul.msk.bf16.gmra.mxu1 %vm633_vm0, %v1465_v37  ;;  %v1486_v37 = vld [vmem:[%s1873_s27 + $0xb8] sm:$0xf0] }
  0x92   : > { %1711 = vmatmul.msk.bf16.gmra.mxu3 %vm633_vm0, %v1601_v43  ;;  %v1489_v42 = vor.u32 %v1743_v36, %v1486_v37 }
  0x95   : > { %v1979_v49 = vpop.f32.mrf.mxu3 }
  0x96   : > { %v910_v48 = vpop.f32.mrf.mxu1 }
  0x9b   : > { %773 = vmatmul.bf16.gmra.mxu0 %v1453_v46  ;;  %853 = vmatmul.bf16.gmra.mxu2 %v1581_v47 }
  0x9d   : > { %v1983_v54 = vpop.f32.mrf.mxu3 }
  0x9e   : > { %v913_v53 = vpop.f32.mrf.mxu1 }
  0xa1   : > { %1695 = vmatmul.msk.bf16.gmra.mxu1 %vm633_vm0, %v1473_v52  ;;  %v1476_v52 = vld [vmem:[%s1873_s27 + $0xa0] sm:$0xf] }
  0xa2   : > { %1712 = vmatmul.msk.bf16.gmra.mxu3 %vm633_vm0, %v1609_v59 }
  0xa5   : > { %v2004_v5 = vpop.f32.mrf.mxu3 }
  0xa6   : > { %v915_v4 = vpop.f32.mrf.mxu1 }
  0xa8   : > { %v739_v0 = vpop.f32.mrf.mxu0 }
  0xa9   : > { %v740_v2 = vadd.f32 %v1993_v60, %v739_v0 }
  0xab   : > { %v909_v6 = vadd.f32 %v908_v38, %v740_v2  ;;  %778 = vmatmul.bf16.gmra.mxu0 %v1461_v63  ;;  %858 = vmatmul.bf16.gmra.mxu2 %v1589_v1 }
  0xad   : > { %vm1068_vm1 = vcmp.ge.f32.partialorder %v909_v6, 0.0  ;;  %v1136_v7 = vmul.f32 %v2002_v3, %v909_v6  ;;  %v2022_v16 = vpop.f32.mrf.mxu3 }
  0xae   : > { %v2016_v11 = vpop.f32.mrf.mxu2  ;;  %v2020_v15 = vpop.f32.mrf.mxu1 }
  0xaf   : > { %v1200_v10 = vsel %vm1068_vm1, %v909_v6, %v1136_v7 }
  0xb0   : > { %1264 = vst [vmem:[%s2011_s22] sm:$0xff] %v1200_v10  ;;  %v741_v12 = vpop.f32.mrf.mxu0 }
  0xb1   : > { %v742_v14 = vadd.f32 %v1993_v60, %v741_v12  ;;  %1696 = vmatmul.msk.bf16.gmra.mxu1 %vm633_vm0, %v1481_v13  ;;  %v1745_v12 = vld [vmem:[%s1873_s27 + $0xc4] sm:$0xf]  ;;  %v1494_v13 = vld [vmem:[%s1873_s27 + $0xc8] sm:$0xf0] }
  0xb2   : > { %1713 = vmatmul.msk.bf16.gmra.mxu3 %vm633_vm0, %v1617_v22  ;;  %v1497_v19 = vor.u32 %v1745_v12, %v1494_v13  ;;  %v1778_v12 = vld [vmem:[%s1873_s27 + $0x1c4] sm:$0xf0] }
  0xb3   : > { %v911_v17 = vadd.f32 %v910_v48, %v742_v14  ;;  %v1777_v48 = vld [vmem:[%s1873_s27 + $0x1c4] sm:$0xf] }
  0xb4   : > { %v1625_v55 = vor.u32 %v1777_v48, %v1622_v50 }
  0xb5   : > { %vm1069_vm2 = vcmp.ge.f32.partialorder %v911_v17, 0.0  ;;  %v1137_v23 = vmul.f32 %v2002_v3, %v911_v17  ;;  %v2039_v33 = vpop.f32.mrf.mxu3 }
  0xb6   : > { %v2032_v27 = vpop.f32.mrf.mxu2  ;;  %v2037_v32 = vpop.f32.mrf.mxu1 }
  0xb7   : > { %v1201_v26 = vsel %vm1069_vm2, %v911_v17, %v1137_v23 }
  0xb8   : > { %1265 = vst [vmem:[%s2011_s22 + $0x8] sm:$0xff] %v1201_v26  ;;  %v744_v29 = vpop.f32.mrf.mxu0  ;;  %v1630_v26 = vld [vmem:[%s1873_s27 + $0x1d8] sm:$0xf0] }
  0xb9   : > { %v745_v31 = vadd.f32 %v1993_v60, %v744_v29  ;;  %v1484_v29 = vld [vmem:[%s1873_s27 + $0xb0] sm:$0xf] }
  0xbb   : > { %v914_v34 = vadd.f32 %v913_v53, %v745_v31  ;;  %783 = vmatmul.bf16.gmra.mxu0 %v1469_v28  ;;  %863 = vmatmul.bf16.gmra.mxu2 %v1597_v30  ;;  %v1742_v53 = vld [vmem:[%s1873_s27 + $0xa4] sm:$0xf0]  ;;  %v1744_v30 = vld [vmem:[%s1873_s27 + $0xb4] sm:$0xf0]  ;;  %v1633_v31 = vor.u32 %v1779_v25, %v1630_v26 }
  0xbc   : > { %v1477_v62 = vor.u32 %v1742_v53, %v1476_v52  ;;  %v1747_v52 = vld [vmem:[%s1873_s27 + $0xd4] sm:$0xf]  ;;  %v1502_v53 = vld [vmem:[%s1873_s27 + $0xd8] sm:$0xf0] }
  0xbd   : > { %vm1070_vm3 = vcmp.ge.f32.partialorder %v914_v34, 0.0  ;;  %v1138_v35 = vmul.f32 %v2002_v3, %v914_v34  ;;  %v2050_v46 = vpop.f32.mrf.mxu3 }
  0xbe   : > { %v824_v39 = vpop.f32.mrf.mxu2  ;;  %v2047_v44 = vpop.f32.mrf.mxu1 }
  0xbf   : > { %v1202_v38 = vsel %vm1070_vm3, %v914_v34, %v1138_v35  ;;  %v825_v40 = vadd.f32 %v1993_v60, %v824_v39  ;;  %v1776_v35 = vld [vmem:[%s1873_s27 + $0x1b4] sm:$0xf0] }
  0xc0   : > { %1266 = vst [vmem:[%s2011_s22 + $0x10] sm:$0xff] %v1202_v38  ;;  %v746_v41 = vpop.f32.mrf.mxu0  ;;  %v1485_v38 = vor.u32 %v1744_v30, %v1484_v29  ;;  %v1749_v29 = vld [vmem:[%s1873_s27 + $0xe4] sm:$0xf]  ;;  %v1510_v30 = vld [vmem:[%s1873_s27 + $0xe8] sm:$0xf0] }
  0xc1   : > { %v747_v43 = vadd.f32 %v1993_v60, %v746_v41  ;;  %v994_v45 = vadd.f32 %v1979_v49, %v825_v40  ;;  %1697 = vmatmul.msk.bf16.gmra.mxu1 %vm633_vm0, %v1489_v42  ;;  %v1774_v49 = vld [vmem:[%s1873_s27 + $0x1a4] sm:$0xf0] }
  0xc2   : > { %1714 = vmatmul.msk.bf16.gmra.mxu3 %vm633_vm0, %v1625_v55  ;;  %v1605_v1 = vor.u32 %v1774_v49, %v1604_v57  ;;  %v1505_v49 = vor.u32 %v1747_v52, %v1502_v53  ;;  %v1780_v52 = vld [vmem:[%s1873_s27 + $0x1d4] sm:$0xf0] }
  0xc3   : > { %v916_v47 = vadd.f32 %v915_v4, %v747_v43  ;;  %vm1102_vm4 = vcmp.ge.f32.partialorder %v994_v45, 0.0  ;;  %v1170_v51 = vmul.f32 %v2002_v3, %v994_v45 }
  0xc5   : > { %vm1071_vm5 = vcmp.ge.f32.partialorder %v916_v47, 0.0  ;;  %v1139_v56 = vmul.f32 %v2002_v3, %v916_v47  ;;  %v1234_v58 = vsel %vm1102_vm4, %v994_v45, %v1170_v51  ;;  %v2069_v7 = vpop.f32.mrf.mxu3 }
  0xc6   : > { %1298 = vst [vmem:[%s2011_s22 + $0x110] sm:$0xff] %v1234_v58  ;;  %v826_v61 = vpop.f32.mrf.mxu2  ;;  %v2066_v4 = vpop.f32.mrf.mxu1 }
  0xc7   : > { %v1203_v59 = vsel %vm1071_vm5, %v916_v47, %v1139_v56  ;;  %v827_v63 = vadd.f32 %v1993_v60, %v826_v61 }
  0xc8   : > { %1267 = vst [vmem:[%s2011_s22 + $0x18] sm:$0xff] %v1203_v59  ;;  %v749_v0 = vpop.f32.mrf.mxu0 }
  0xc9   : > { %v750_v2 = vadd.f32 %v1993_v60, %v749_v0  ;;  %v996_v6 = vadd.f32 %v1983_v54, %v827_v63  ;;  %v1781_v0 = vld [vmem:[%s1873_s27 + $0x1e4] sm:$0xf] }
  0xcb   : > { %v919_v8 = vadd.f32 %v2020_v15, %v750_v2  ;;  %788 = vmatmul.bf16.gmra.mxu0 %v1477_v62  ;;  %vm1103_vm6 = vcmp.ge.f32.partialorder %v996_v6, 0.0  ;;  %v1171_v9 = vmul.f32 %v2002_v3, %v996_v6  ;;  %868 = vmatmul.bf16.gmra.mxu2 %v1605_v1  ;;  %v1638_v1 = vld [vmem:[%s1873_s27 + $0x1e8] sm:$0xf0] }
  0xcd   : > { %vm1072_vm7 = vcmp.ge.f32.partialorder %v919_v8, 0.0  ;;  %v1140_v10 = vmul.f32 %v2002_v3, %v919_v8  ;;  %v1235_v14 = vsel %vm1103_vm6, %v996_v6, %v1171_v9  ;;  %v2083_v23 = vpop.f32.mrf.mxu3  ;;  %v1492_v6 = vld [vmem:[%s1873_s27 + $0xc0] sm:$0xf]  ;;  %v1641_v9 = vor.u32 %v1781_v0, %v1638_v1 }
  0xce   : > { %1299 = vst [vmem:[%s2011_s22 + $0x118] sm:$0xff] %v1235_v14  ;;  %v829_v54 = vpop.f32.mrf.mxu2  ;;  %v2080_v21 = vpop.f32.mrf.mxu1 }
  0xcf   : > { %v1204_v17 = vsel %vm1072_vm7, %v919_v8, %v1140_v10  ;;  %v830_v15 = vadd.f32 %v1993_v60, %v829_v54  ;;  %v1746_v8 = vld [vmem:[%s1873_s27 + $0xc4] sm:$0xf0] }
  0xd0   : > { %1268 = vst [vmem:[%s2011_s22 + $0x20] sm:$0xff] %v1204_v17  ;;  %v751_v18 = vpop.f32.mrf.mxu0  ;;  %v1493_v17 = vor.u32 %v1746_v8, %v1492_v6  ;;  %v1518_v6 = vld [vmem:[%s1873_s27 + $0xf8] sm:$0xf0] }
  0xd1   : > { %v752_v20 = vadd.f32 %v1993_v60, %v751_v18  ;;  %v999_v22 = vadd.f32 %v2004_v5, %v830_v15  ;;  %1698 = vmatmul.msk.bf16.gmra.mxu1 %vm633_vm0, %v1497_v19  ;;  %v1612_v5 = vld [vmem:[%s1873_s27 + $0x1b0] sm:$0xf] }
  0xd2   : > { %1715 = vmatmul.msk.bf16.gmra.mxu3 %vm633_vm0, %v1633_v31  ;;  %v1613_v41 = vor.u32 %v1776_v35, %v1612_v5  ;;  %v1513_v35 = vor.u32 %v1749_v29, %v1510_v30 }
  0xd3   : > { %v921_v24 = vadd.f32 %v2037_v32, %v752_v20  ;;  %vm1104_vm8 = vcmp.ge.f32.partialorder %v999_v22, 0.0  ;;  %v1172_v28 = vmul.f32 %v2002_v3, %v999_v22 }
  0xd5   : > { %vm1073_vm9 = vcmp.ge.f32.partialorder %v921_v24, 0.0  ;;  %v1141_v34 = vmul.f32 %v2002_v3, %v921_v24  ;;  %v1236_v36 = vsel %vm1104_vm8, %v999_v22, %v1172_v28  ;;  %v2103_v47 = vpop.f32.mrf.mxu3 }
  0xd6   : > { %1300 = vst [vmem:[%s2011_s22 + $0x120] sm:$0xff] %v1236_v36  ;;  %v831_v32 = vpop.f32.mrf.mxu2  ;;  %v2100_v43 = vpop.f32.mrf.mxu1 }
  0xd7   : > { %v1205_v37 = vsel %vm1073_vm9, %v921_v24, %v1141_v34  ;;  %v832_v39 = vadd.f32 %v1993_v60, %v831_v32 }
  0xd8   : > { %1269 = vst [vmem:[%s2011_s22 + $0x28] sm:$0xff] %v1205_v37  ;;  %v754_v40 = vpop.f32.mrf.mxu0 }
  0xd9   : > { %v755_v42 = vadd.f32 %v1993_v60, %v754_v40  ;;  %v1001_v45 = vadd.f32 %v2022_v16, %v832_v39  ;;  %v1783_v39 = vld [vmem:[%s1873_s27 + $0x1f4] sm:$0xf]  ;;  %v1646_v40 = vld [vmem:[%s1873_s27 + $0x1f8] sm:$0xf0] }
  0xdb   : > { %v924_v48 = vadd.f32 %v2047_v44, %v755_v42  ;;  %793 = vmatmul.bf16.gmra.mxu0 %v1485_v38  ;;  %vm1105_vm10 = vcmp.ge.f32.partialorder %v1001_v45, 0.0  ;;  %v1173_v50 = vmul.f32 %v2002_v3, %v1001_v45  ;;  %873 = vmatmul.bf16.gmra.mxu2 %v1613_v41  ;;  %v1500_v42 = vld [vmem:[%s1873_s27 + $0xd0] sm:$0xf] }
  0xdd   : > { %vm1074_vm11 = vcmp.ge.f32.partialorder %v924_v48, 0.0  ;;  %v1142_v51 = vmul.f32 %v2002_v3, %v924_v48  ;;  %v1237_v55 = vsel %vm1105_vm10, %v1001_v45, %v1173_v50  ;;  %v2117_v62 = vpop.f32.mrf.mxu3  ;;  %v1748_v45 = vld [vmem:[%s1873_s27 + $0xd4] sm:$0xf0] }
  0xde   : > { %1301 = vst [vmem:[%s2011_s22 + $0x128] sm:$0xff] %v1237_v55  ;;  %v834_v16 = vpop.f32.mrf.mxu2  ;;  %v2114_v59 = vpop.f32.mrf.mxu1 }
  0xdf   : > { %v1206_v56 = vsel %vm1074_vm11, %v924_v48, %v1142_v51  ;;  %v835_v44 = vadd.f32 %v1993_v60, %v834_v16  ;;  %v1649_v48 = vor.u32 %v1783_v39, %v1646_v40  ;;  %v1628_v51 = vld [vmem:[%s1873_s27 + $0x1d0] sm:$0xf]  ;;  %v1526_v39 = vld [vmem:[%s1873_s27 + $0x108] sm:$0xf0] }
  0xe0   : > { %1270 = vst [vmem:[%s2011_s22 + $0x30] sm:$0xff] %v1206_v56  ;;  %v756_v57 = vpop.f32.mrf.mxu0  ;;  %v1501_v56 = vor.u32 %v1748_v45, %v1500_v42 }
  0xe1   : > { %v757_v58 = vadd.f32 %v1993_v60, %v756_v57  ;;  %v1004_v61 = vadd.f32 %v2039_v33, %v835_v44  ;;  %1699 = vmatmul.msk.bf16.gmra.mxu1 %vm633_vm0, %v1505_v49  ;;  %v1620_v33 = vld [vmem:[%s1873_s27 + $0x1c0] sm:$0xf]  ;;  %v1629_v57 = vor.u32 %v1780_v52, %v1628_v51 }
  0xe2   : > { %1716 = vmatmul.msk.bf16.gmra.mxu3 %vm633_vm0, %v1641_v9  ;;  %v1621_v18 = vor.u32 %v1778_v12, %v1620_v33 }
  0xe3   : > { %v926_v63 = vadd.f32 %v2066_v4, %v757_v58  ;;  %vm1106_vm12 = vcmp.ge.f32.partialorder %v1004_v61, 0.0  ;;  %v1174_v2 = vmul.f32 %v2002_v3, %v1004_v61 }
  0xe5   : > { %vm1075_vm13 = vcmp.ge.f32.partialorder %v926_v63, 0.0  ;;  %v1143_v10 = vmul.f32 %v2002_v3, %v926_v63  ;;  %v1238_v13 = vsel %vm1106_vm12, %v1004_v61, %v1174_v2  ;;  %v2138_v25 = vpop.f32.mrf.mxu3  ;;  %v1751_v2 = vld [vmem:[%s1873_s27 + $0xf4] sm:$0xf] }
  0xe6   : > { %1302 = vst [vmem:[%s2011_s22 + $0x130] sm:$0xff] %v1238_v13  ;;  %v836_v4 = vpop.f32.mrf.mxu2  ;;  %v2134_v20 = vpop.f32.mrf.mxu1  ;;  %v1521_v12 = vor.u32 %v1751_v2, %v1518_v6 }
  0xe7   : > { %v1207_v14 = vsel %vm1075_vm13, %v926_v63, %v1143_v10  ;;  %v837_v54 = vadd.f32 %v1993_v60, %v836_v4 }
  0xe8   : > { %1271 = vst [vmem:[%s2011_s22 + $0x38] sm:$0xff] %v1207_v14  ;;  %v759_v15 = vpop.f32.mrf.mxu0 }
  0xe9   : > { %v760_v19 = vadd.f32 %v1993_v60, %v759_v15  ;;  %v1006_v22 = vadd.f32 %v2050_v46, %v837_v54  ;;  %v1508_v15 = vld [vmem:[%s1873_s27 + $0xe0] sm:$0xf] }
  0xeb   : > { %v929_v24 = vadd.f32 %v2080_v21, %v760_v19  ;;  %798 = vmatmul.bf16.gmra.mxu0 %v1493_v17  ;;  %vm1107_vm14 = vcmp.ge.f32.partialorder %v1006_v22, 0.0  ;;  %v1175_v26 = vmul.f32 %v2002_v3, %v1006_v22  ;;  %878 = vmatmul.bf16.gmra.mxu2 %v1621_v18  ;;  %v1750_v18 = vld [vmem:[%s1873_s27 + $0xe4] sm:$0xf0] }
  0xed   : > { %vm1076_vm15 = vcmp.ge.f32.partialorder %v929_v24, 0.0  ;;  %v1144_v28 = vmul.f32 %v2002_v3, %v929_v24  ;;  %v1239_v31 = vsel %vm1107_vm14, %v1006_v22, %v1175_v26  ;;  %v1636_v22 = vld [vmem:[%s1873_s27 + $0x1e0] sm:$0xf] }
  0xee   : > { %1303 = vst [vmem:[%s2011_s22 + $0x138] sm:$0xff] %v1239_v31  ;;  %v839_v21 = vpop.f32.mrf.mxu2  ;;  %v2148_v37 = vpop.f32.mrf.mxu1 }
  0xef   : > { %v1208_v46 = vsel %vm1076_vm15, %v929_v24, %v1144_v28  ;;  %v840_v34 = vadd.f32 %v1993_v60, %v839_v21  ;;  %v1782_v24 = vld [vmem:[%s1873_s27 + $0x1e4] sm:$0xf0] }
  0xf0   : > { %1272 = vst [vmem:[%s2011_s22 + $0x40] sm:$0xff] %v1208_v46  ;;  %v761_v5 = vpop.f32.mrf.mxu0  ;;  %v1637_v31 = vor.u32 %v1782_v24, %v1636_v22 }
  0xf1   : > { %v762_v36 = vadd.f32 %v1993_v60, %v761_v5  ;;  %v1009_v32 = vadd.f32 %v2069_v7, %v840_v34  ;;  %1700 = vmatmul.msk.bf16.gmra.mxu1 %vm633_vm0, %v1513_v35  ;;  %v2161_v7 = vpop.f32.mrf.mxu3 }
  0xf2   : > { %1717 = vmatmul.msk.bf16.gmra.mxu3 %vm633_vm0, %v1649_v48 }
  0xf3   : > { %v931_v38 = vadd.f32 %v2100_v43, %v762_v36  ;;  %vm1108_vm1 = vcmp.ge.f32.partialorder %v1009_v32, 0.0  ;;  %v1176_v41 = vmul.f32 %v2002_v3, %v1009_v32 }
  0xf5   : > { %vm1077_vm2 = vcmp.ge.f32.partialorder %v931_v38, 0.0  ;;  %v1145_v50 = vmul.f32 %v2002_v3, %v931_v38  ;;  %v1240_v53 = vsel %vm1108_vm1, %v1009_v32, %v1176_v41 }
  0xf6   : > { %1304 = vst [vmem:[%s2011_s22 + $0x140] sm:$0xff] %v1240_v53  ;;  %v841_v55 = vpop.f32.mrf.mxu2  ;;  %v2168_v58 = vpop.f32.mrf.mxu1 }
  0xf7   : > { %v1209_v43 = vsel %vm1077_vm2, %v931_v38, %v1145_v50  ;;  %v842_v16 = vadd.f32 %v1993_v60, %v841_v55  ;;  %v1753_v38 = vld [vmem:[%s1873_s27 + $0x104] sm:$0xf]  ;;  %v1516_v55 = vld [vmem:[%s1873_s27 + $0xf0] sm:$0xf] }
  0xf8   : > { %1273 = vst [vmem:[%s2011_s22 + $0x48] sm:$0xff] %v1209_v43  ;;  %v764_v44 = vpop.f32.mrf.mxu0  ;;  %v1529_v45 = vor.u32 %v1753_v38, %v1526_v39 }
  0xf9   : > { %v765_v49 = vadd.f32 %v1993_v60, %v764_v44  ;;  %v1011_v61 = vadd.f32 %v2083_v23, %v842_v16  ;;  %v2177_v33 = vpop.f32.mrf.mxu3  ;;  %v1644_v44 = vld [vmem:[%s1873_s27 + $0x1f0] sm:$0xf] }
  0xfb   : > { %v934_v63 = vadd.f32 %v2114_v59, %v765_v49  ;;  %803 = vmatmul.bf16.gmra.mxu0 %v1501_v56  ;;  %vm1109_vm3 = vcmp.ge.f32.partialorder %v1011_v61, 0.0  ;;  %v1177_v0 = vmul.f32 %v2002_v3, %v1011_v61  ;;  %883 = vmatmul.bf16.gmra.mxu2 %v1629_v57  ;;  %v1752_v56 = vld [vmem:[%s1873_s27 + $0xf4] sm:$0xf0] }
  0xfc   : > { %v1784_v57 = vld [vmem:[%s1873_s27 + $0x1f4] sm:$0xf0] }
  0xfd   : > { %vm1078_vm4 = vcmp.ge.f32.partialorder %v934_v63, 0.0  ;;  %v1146_v1 = vmul.f32 %v2002_v3, %v934_v63  ;;  %v1241_v8 = vsel %vm1109_vm3, %v1011_v61, %v1177_v0 }
  0xfe   : > { %1305 = vst [vmem:[%s2011_s22 + $0x148] sm:$0xff] %v1241_v8  ;;  %v844_v10 = vpop.f32.mrf.mxu2  ;;  %v2182_v14 = vpop.f32.mrf.mxu1 }
  0xff   : > { %v1210_v9 = vsel %vm1078_vm4, %v934_v63, %v1146_v1  ;;  %v845_v23 = vadd.f32 %v1993_v60, %v844_v10  ;;  %v1645_v1 = vor.u32 %v1784_v57, %v1644_v44 }
 0x100   : > { %1274 = vst [vmem:[%s2011_s22 + $0x50] sm:$0xff] %v1210_v9  ;;  %v766_v59 = vpop.f32.mrf.mxu0 }
 0x101   : > { %v767_v13 = vadd.f32 %v1993_v60, %v766_v59  ;;  %v1014_v4 = vadd.f32 %v2103_v47, %v845_v23  ;;  %1701 = vmatmul.msk.bf16.gmra.mxu1 %vm633_vm0, %v1521_v12  ;;  %v1509_v47 = vor.u32 %v1750_v18, %v1508_v15  ;;  %v2199_v34 = vpop.f32.mrf.mxu3 }
 0x103   : > { %v936_v17 = vadd.f32 %v2134_v20, %v767_v13  ;;  %vm1110_vm5 = vcmp.ge.f32.partialorder %v1014_v4, 0.0  ;;  %v1178_v54 = vmul.f32 %v2002_v3, %v1014_v4 }
 0x105   : > { %vm1079_vm6 = vcmp.ge.f32.partialorder %v936_v17, 0.0  ;;  %v1147_v19 = vmul.f32 %v2002_v3, %v936_v17  ;;  %v1242_v26 = vsel %vm1110_vm5, %v1014_v4, %v1178_v54 }
 0x106   : > { %1306 = vst [vmem:[%s2011_s22 + $0x150] sm:$0xff] %v1242_v26  ;;  %v846_v29 = vpop.f32.mrf.mxu2  ;;  %v2197_v21 = vpop.f32.mrf.mxu1 }
 0x107   : > { %v1211_v28 = vsel %vm1079_vm6, %v936_v17, %v1147_v19  ;;  %v847_v20 = vadd.f32 %v1993_v60, %v846_v29 }
 0x108   : > { %1275 = vst [vmem:[%s2011_s22 + $0x58] sm:$0xff] %v1211_v28  ;;  %v769_v30 = vpop.f32.mrf.mxu0 }
 0x109   : > { %v770_v46 = vadd.f32 %v1993_v60, %v769_v30  ;;  %v1016_v5 = vadd.f32 %v2117_v62, %v847_v20  ;;  %v2213_v53 = vpop.f32.mrf.mxu3 }
 0x10b   : > { %v939_v35 = vadd.f32 %v2148_v37, %v770_v46  ;;  %808 = vmatmul.bf16.gmra.mxu0 %v1509_v47  ;;  %vm1111_vm7 = vcmp.ge.f32.partialorder %v1016_v5, 0.0  ;;  %v1179_v36 = vmul.f32 %v2002_v3, %v1016_v5  ;;  %888 = vmatmul.bf16.gmra.mxu2 %v1637_v31 }
 0x10d   : > { %vm1080_vm8 = vcmp.ge.f32.partialorder %v939_v35, 0.0  ;;  %v1148_v32 = vmul.f32 %v2002_v3, %v939_v35  ;;  %v1243_v40 = vsel %vm1111_vm7, %v1016_v5, %v1179_v36 }
 0x10e   : > { %1307 = vst [vmem:[%s2011_s22 + $0x158] sm:$0xff] %v1243_v40  ;;  %v849_v42 = vpop.f32.mrf.mxu2  ;;  %v948_v50 = vpop.f32.mrf.mxu1 }
 0x10f   : > { %v1212_v41 = vsel %vm1080_vm8, %v939_v35, %v1148_v32  ;;  %v850_v62 = vadd.f32 %v1993_v60, %v849_v42 }
 0x110   : > { %1276 = vst [vmem:[%s2011_s22 + $0x60] sm:$0xff] %v1212_v41  ;;  %v771_v37 = vpop.f32.mrf.mxu0 }
 0x111   : > { %v772_v48 = vadd.f32 %v1993_v60, %v771_v37  ;;  %v1019_v51 = vadd.f32 %v2138_v25, %v850_v62  ;;  %1702 = vmatmul.msk.bf16.gmra.mxu1 %vm633_vm0, %v1529_v45  ;;  %v1030_v59 = vpop.f32.mrf.mxu3 }
 0x113   : > { %v941_v52 = vadd.f32 %v2168_v58, %v772_v48  ;;  %vm1112_vm9 = vcmp.ge.f32.partialorder %v1019_v51, 0.0  ;;  %v1180_v43 = vmul.f32 %v2002_v3, %v1019_v51  ;;  %v1517_v58 = vor.u32 %v1752_v56, %v1516_v55 }
 0x115   : > { %vm1081_vm10 = vcmp.ge.f32.partialorder %v941_v52, 0.0  ;;  %v1149_v16 = vmul.f32 %v2002_v3, %v941_v52  ;;  %v1244_v49 = vsel %vm1112_vm9, %v1019_v51, %v1180_v43 }
 0x116   : > { %1308 = vst [vmem:[%s2011_s22 + $0x160] sm:$0xff] %v1244_v49  ;;  %v851_v61 = vpop.f32.mrf.mxu2  ;;  %v950_v6 = vpop.f32.mrf.mxu1 }
 0x117   : > { %v1213_v25 = vsel %vm1081_vm10, %v941_v52, %v1149_v16  ;;  %v852_v63 = vadd.f32 %v1993_v60, %v851_v61 }
 0x118   : > { %1277 = vst [vmem:[%s2011_s22 + $0x68] sm:$0xff] %v1213_v25  ;;  %v774_v0 = vpop.f32.mrf.mxu0 }
 0x119   : > { %v775_v2 = vadd.f32 %v1993_v60, %v774_v0  ;;  %v1021_v8 = vadd.f32 %v2161_v7, %v852_v63  ;;  %v1033_v29 = vpop.f32.mrf.mxu3 }
 0x11b   : > { %v944_v9 = vadd.f32 %v2182_v14, %v775_v2  ;;  %813 = vmatmul.bf16.gmra.mxu0 %v1517_v58  ;;  %vm1113_vm0 = vcmp.ge.f32.partialorder %v1021_v8, 0.0  ;;  %v1181_v10 = vmul.f32 %v2002_v3, %v1021_v8  ;;  %893 = vmatmul.bf16.gmra.mxu2 %v1645_v1 }
 0x11d   : > { %vm1082_vm11 = vcmp.ge.f32.partialorder %v944_v9, 0.0  ;;  %v1150_v23 = vmul.f32 %v2002_v3, %v944_v9  ;;  %v1245_v12 = vsel %vm1113_vm0, %v1021_v8, %v1181_v10 }
 0x11e   : > { %1309 = vst [vmem:[%s2011_s22 + $0x168] sm:$0xff] %v1245_v12  ;;  %v854_v4 = vpop.f32.mrf.mxu2  ;;  %v953_v54 = vpop.f32.mrf.mxu1 }
 0x11f   : > { %v1214_v13 = vsel %vm1082_vm11, %v944_v9, %v1150_v23  ;;  %v855_v7 = vadd.f32 %v1993_v60, %v854_v4 }
 0x120   : > { %1278 = vst [vmem:[%s2011_s22 + $0x70] sm:$0xff] %v1214_v13  ;;  %v776_v17 = vpop.f32.mrf.mxu0 }
 0x121   : > { %v777_v14 = vadd.f32 %v1993_v60, %v776_v17  ;;  %v1024_v15 = vadd.f32 %v2177_v33, %v855_v7  ;;  %v1035_v41 = vpop.f32.mrf.mxu3 }
 0x123   : > { %v946_v18 = vadd.f32 %v2197_v21, %v777_v14  ;;  %vm1114_vm12 = vcmp.ge.f32.partialorder %v1024_v15, 0.0  ;;  %v1182_v19 = vmul.f32 %v2002_v3, %v1024_v15 }
 0x125   : > { %vm1083_vm13 = vcmp.ge.f32.partialorder %v946_v18, 0.0  ;;  %v1151_v22 = vmul.f32 %v2002_v3, %v946_v18  ;;  %v1246_v24 = vsel %vm1114_vm12, %v1024_v15, %v1182_v19 }
 0x126   : > { %1310 = vst [vmem:[%s2011_s22 + $0x170] sm:$0xff] %v1246_v24  ;;  %v856_v28 = vpop.f32.mrf.mxu2  ;;  %v955_v30 = vpop.f32.mrf.mxu1 }
 0x127   : > { %v1215_v26 = vsel %vm1083_vm13, %v946_v18, %v1151_v22  ;;  %v857_v47 = vadd.f32 %v1993_v60, %v856_v28 }
 0x128   : > { %1279 = vst [vmem:[%s2011_s22 + $0x78] sm:$0xff] %v1215_v26  ;;  %v779_v20 = vpop.f32.mrf.mxu0 }
 0x129   : > { %v780_v33 = vadd.f32 %v1993_v60, %v779_v20  ;;  %v1026_v31 = vadd.f32 %v2199_v34, %v857_v47  ;;  %v1038_v44 = vpop.f32.mrf.mxu3 }
 0x12b   : > { %v949_v46 = vadd.f32 %v948_v50, %v780_v33  ;;  %vm1115_vm14 = vcmp.ge.f32.partialorder %v1026_v31, 0.0  ;;  %v1183_v21 = vmul.f32 %v2002_v3, %v1026_v31 }
 0x12d   : > { %vm1084_vm15 = vcmp.ge.f32.partialorder %v949_v46, 0.0  ;;  %v1152_v5 = vmul.f32 %v2002_v3, %v949_v46  ;;  %v1247_v35 = vsel %vm1115_vm14, %v1026_v31, %v1183_v21 }
 0x12e   : > { %1311 = vst [vmem:[%s2011_s22 + $0x178] sm:$0xff] %v1247_v35  ;;  %v859_v32 = vpop.f32.mrf.mxu2  ;;  %v958_v34 = vpop.f32.mrf.mxu1 }
 0x12f   : > { %v1216_v36 = vsel %vm1084_vm15, %v949_v46, %v1152_v5  ;;  %v860_v38 = vadd.f32 %v1993_v60, %v859_v32 }
 0x130   : > { %1280 = vst [vmem:[%s2011_s22 + $0x80] sm:$0xff] %v1216_v36  ;;  %v781_v39 = vpop.f32.mrf.mxu0 }
 0x131   : > { %v782_v40 = vadd.f32 %v1993_v60, %v781_v39  ;;  %v1029_v42 = vadd.f32 %v2213_v53, %v860_v38  ;;  %v1040_v23 = vpop.f32.mrf.mxu3 }
 0x133   : > { %v951_v62 = vadd.f32 %v950_v6, %v782_v40  ;;  %vm1116_vm1 = vcmp.ge.f32.partialorder %v1029_v42, 0.0  ;;  %v1184_v37 = vmul.f32 %v2002_v3, %v1029_v42 }
 0x135   : > { %vm1085_vm2 = vcmp.ge.f32.partialorder %v951_v62, 0.0  ;;  %v1153_v45 = vmul.f32 %v2002_v3, %v951_v62  ;;  %v1248_v48 = vsel %vm1116_vm1, %v1029_v42, %v1184_v37 }
 0x136   : > { %1312 = vst [vmem:[%s2011_s22 + $0x180] sm:$0xff] %v1248_v48  ;;  %v861_v51 = vpop.f32.mrf.mxu2  ;;  %v960_v53 = vpop.f32.mrf.mxu1 }
 0x137   : > { %v1217_v50 = vsel %vm1085_vm2, %v951_v62, %v1153_v45  ;;  %v862_v52 = vadd.f32 %v1993_v60, %v861_v51 }
 0x138   : > { %1281 = vst [vmem:[%s2011_s22 + $0x88] sm:$0xff] %v1217_v50  ;;  %v784_v43 = vpop.f32.mrf.mxu0 }
 0x139   : > { %v785_v55 = vadd.f32 %v1993_v60, %v784_v43  ;;  %v1031_v56 = vadd.f32 %v1030_v59, %v862_v52  ;;  %v1043_v28 = vpop.f32.mrf.mxu3 }
 0x13b   : > { %v954_v16 = vadd.f32 %v953_v54, %v785_v55  ;;  %vm1117_vm3 = vcmp.ge.f32.partialorder %v1031_v56, 0.0  ;;  %v1185_v57 = vmul.f32 %v2002_v3, %v1031_v56 }
 0x13d   : > { %vm1086_vm4 = vcmp.ge.f32.partialorder %v954_v16, 0.0  ;;  %v1154_v49 = vmul.f32 %v2002_v3, %v954_v16  ;;  %v1249_v25 = vsel %vm1117_vm3, %v1031_v56, %v1185_v57 }
 0x13e   : > { %1313 = vst [vmem:[%s2011_s22 + $0x188] sm:$0xff] %v1249_v25  ;;  %v864_v58 = vpop.f32.mrf.mxu2  ;;  %v963_v2 = vpop.f32.mrf.mxu1 }
 0x13f   : > { %v1218_v61 = vsel %vm1086_vm4, %v954_v16, %v1154_v49  ;;  %v865_v63 = vadd.f32 %v1993_v60, %v864_v58 }
 0x140   : > { %1282 = vst [vmem:[%s2011_s22 + $0x90] sm:$0xff] %v1218_v61  ;;  %v786_v0 = vpop.f32.mrf.mxu0 }
 0x141   : > { %v787_v1 = vadd.f32 %v1993_v60, %v786_v0  ;;  %v1034_v6 = vadd.f32 %v1033_v29, %v865_v63 }
 0x143   : > { %v956_v8 = vadd.f32 %v955_v30, %v787_v1  ;;  %vm1118_vm5 = vcmp.ge.f32.partialorder %v1034_v6, 0.0  ;;  %v1186_v9 = vmul.f32 %v2002_v3, %v1034_v6 }
 0x145   : > { %vm1087_vm6 = vcmp.ge.f32.partialorder %v956_v8, 0.0  ;;  %v1155_v10 = vmul.f32 %v2002_v3, %v956_v8  ;;  %v1250_v59 = vsel %vm1118_vm5, %v1034_v6, %v1186_v9 }
 0x146   : > { %1314 = vst [vmem:[%s2011_s22 + $0x190] sm:$0xff] %v1250_v59  ;;  %v866_v13 = vpop.f32.mrf.mxu2  ;;  %v965_v14 = vpop.f32.mrf.mxu1 }
 0x147   : > { %v1219_v12 = vsel %vm1087_vm6, %v956_v8, %v1155_v10  ;;  %v867_v4 = vadd.f32 %v1993_v60, %v866_v13 }
 0x148   : > { %1283 = vst [vmem:[%s2011_s22 + $0x98] sm:$0xff] %v1219_v12  ;;  %v789_v7 = vpop.f32.mrf.mxu0 }
 0x149   : > { %v790_v17 = vadd.f32 %v1993_v60, %v789_v7  ;;  %v1036_v54 = vadd.f32 %v1035_v41, %v867_v4 }
 0x14b   : > { %v959_v15 = vadd.f32 %v958_v34, %v790_v17  ;;  %vm1119_vm7 = vcmp.ge.f32.partialorder %v1036_v54, 0.0  ;;  %v1187_v18 = vmul.f32 %v2002_v3, %v1036_v54  ;;  %v1045_v34 = vpop.f32.mrf.mxu3 }
 0x14d   : > { %vm1088_vm8 = vcmp.ge.f32.partialorder %v959_v15, 0.0  ;;  %v1156_v19 = vmul.f32 %v2002_v3, %v959_v15  ;;  %v1251_v22 = vsel %vm1119_vm7, %v1036_v54, %v1187_v18 }
 0x14e   : > { %1315 = vst [vmem:[%s2011_s22 + $0x198] sm:$0xff] %v1251_v22  ;;  %v869_v26 = vpop.f32.mrf.mxu2  ;;  %v968_v33 = vpop.f32.mrf.mxu1 }
 0x14f   : > { %v1220_v24 = vsel %vm1088_vm8, %v959_v15, %v1156_v19  ;;  %v870_v29 = vadd.f32 %v1993_v60, %v869_v26 }
 0x150   : > { %1284 = vst [vmem:[%s2011_s22 + $0xa0] sm:$0xff] %v1220_v24  ;;  %v791_v47 = vpop.f32.mrf.mxu0 }
 0x151   : > { %v792_v20 = vadd.f32 %v1993_v60, %v791_v47  ;;  %v1039_v30 = vadd.f32 %v1038_v44, %v870_v29 }
 0x153   : > { %v961_v31 = vadd.f32 %v960_v53, %v792_v20  ;;  %vm1120_vm9 = vcmp.ge.f32.partialorder %v1039_v30, 0.0  ;;  %v1188_v46 = vmul.f32 %v2002_v3, %v1039_v30  ;;  %v1048_v16 = vpop.f32.mrf.mxu3 }
 0x155   : > { %vm1089_vm10 = vcmp.ge.f32.partialorder %v961_v31, 0.0  ;;  %v1157_v21 = vmul.f32 %v2002_v3, %v961_v31  ;;  %v1252_v5 = vsel %vm1120_vm9, %v1039_v30, %v1188_v46 }
 0x156   : > { %1316 = vst [vmem:[%s2011_s22 + $0x1a0] sm:$0xff] %v1252_v5  ;;  %v871_v36 = vpop.f32.mrf.mxu2  ;;  %v970_v40 = vpop.f32.mrf.mxu1 }
 0x157   : > { %v1221_v35 = vsel %vm1089_vm10, %v961_v31, %v1157_v21  ;;  %v872_v32 = vadd.f32 %v1993_v60, %v871_v36  ;;  %v2311_v36 = vld [vmem:[%s2364_s2] ss:$0 sm:$0xff] }
 0x158   : > { %1285 = vst [vmem:[%s2011_s22 + $0xa8] sm:$0xff] %v1221_v35  ;;  %v794_v38 = vpop.f32.mrf.mxu0 }
 0x159   : > { %v795_v39 = vadd.f32 %v1993_v60, %v794_v38  ;;  %v1041_v41 = vadd.f32 %v1040_v23, %v872_v32 }
 0x15b   : > { %v964_v42 = vadd.f32 %v963_v2, %v795_v39  ;;  %vm1121_vm0 = vcmp.ge.f32.partialorder %v1041_v41, 0.0  ;;  %v1189_v62 = vmul.f32 %v2002_v3, %v1041_v41  ;;  %v1050_v10 = vpop.f32.mrf.mxu3 }
 0x15d   : > { %vm1090_vm11 = vcmp.ge.f32.partialorder %v964_v42, 0.0  ;;  %v1158_v37 = vmul.f32 %v2002_v3, %v964_v42  ;;  %v1253_v45 = vsel %vm1121_vm0, %v1041_v41, %v1189_v62  ;;  %v2318_v41 = vld [vmem:[%s2365_s3] ss:$0 sm:$0xff] }
 0x15e   : > { %1317 = vst [vmem:[%s2011_s22 + $0x1a8] sm:$0xff] %v1253_v45  ;;  %v874_v50 = vpop.f32.mrf.mxu2  ;;  %v973_v55 = vpop.f32.mrf.mxu1 }
 0x15f   : > { %v1222_v48 = vsel %vm1090_vm11, %v964_v42, %v1158_v37  ;;  %v875_v51 = vadd.f32 %v1993_v60, %v874_v50 }
 0x160   : > { %1286 = vst [vmem:[%s2011_s22 + $0xb0] sm:$0xff] %v1222_v48  ;;  %v796_v52 = vpop.f32.mrf.mxu0 }
 0x161   : > { %v797_v43 = vadd.f32 %v1993_v60, %v796_v52  ;;  %v1044_v53 = vadd.f32 %v1043_v28, %v875_v51 }
 0x163   : > { %v966_v56 = vadd.f32 %v965_v14, %v797_v43  ;;  %vm1122_vm12 = vcmp.ge.f32.partialorder %v1044_v53, 0.0  ;;  %v1190_v44 = vmul.f32 %v2002_v3, %v1044_v53  ;;  %v1053_v26 = vpop.f32.mrf.mxu3 }
 0x165   : > { %vm1091_vm13 = vcmp.ge.f32.partialorder %v966_v56, 0.0  ;;  %v1159_v57 = vmul.f32 %v2002_v3, %v966_v56  ;;  %v1254_v49 = vsel %vm1122_vm12, %v1044_v53, %v1190_v44 }
 0x166   : > { %1318 = vst [vmem:[%s2011_s22 + $0x1b0] sm:$0xff] %v1254_v49  ;;  %v876_v61 = vpop.f32.mrf.mxu2  ;;  %v975_v1 = vpop.f32.mrf.mxu1 }
 0x167   : > { %v1223_v25 = vsel %vm1091_vm13, %v966_v56, %v1159_v57  ;;  %v877_v58 = vadd.f32 %v1993_v60, %v876_v61  ;;  %v820_v61 = vadd.f32 %v2311_v36, %v2016_v11 }
 0x168   : > { %1287 = vst [vmem:[%s2011_s22 + $0xb8] sm:$0xff] %v1223_v25  ;;  %v799_v63 = vpop.f32.mrf.mxu0 }
 0x169   : > { %v800_v0 = vadd.f32 %v1993_v60, %v799_v63  ;;  %v1046_v2 = vadd.f32 %v1045_v34, %v877_v58 }
 0x16b   : > { %v969_v6 = vadd.f32 %v968_v33, %v800_v0  ;;  %vm1123_vm14 = vcmp.ge.f32.partialorder %v1046_v2, 0.0  ;;  %v1191_v8 = vmul.f32 %v2002_v3, %v1046_v2 }
 0x16d   : > { %vm1092_vm15 = vcmp.ge.f32.partialorder %v969_v6, 0.0  ;;  %v1160_v9 = vmul.f32 %v2002_v3, %v969_v6  ;;  %v1255_v23 = vsel %vm1123_vm14, %v1046_v2, %v1191_v8 }
 0x16e   : > { %1319 = vst [vmem:[%s2011_s22 + $0x1b8] sm:$0xff] %v1255_v23  ;;  %v879_v12 = vpop.f32.mrf.mxu2  ;;  %v978_v17 = vpop.f32.mrf.mxu1 }
 0x16f   : > { %v1224_v59 = vsel %vm1092_vm15, %v969_v6, %v1160_v9  ;;  %v880_v13 = vadd.f32 %v1993_v60, %v879_v12 }
 0x170   : > { %1288 = vst [vmem:[%s2011_s22 + $0xc0] sm:$0xff] %v1224_v59  ;;  %v801_v4 = vpop.f32.mrf.mxu0 }
 0x171   : > { %v802_v7 = vadd.f32 %v1993_v60, %v801_v4  ;;  %v1049_v14 = vadd.f32 %v1048_v16, %v880_v13 }
 0x173   : > { %v971_v54 = vadd.f32 %v970_v40, %v802_v7  ;;  %vm1124_vm1 = vcmp.ge.f32.partialorder %v1049_v14, 0.0  ;;  %v1192_v15 = vmul.f32 %v2002_v3, %v1049_v14  ;;  %v1055_v40 = vpop.f32.mrf.mxu3  ;;  %v822_v7 = vadd.f32 %v2311_v36, %v2032_v27 }
 0x175   : > { %vm1093_vm2 = vcmp.ge.f32.partialorder %v971_v54, 0.0  ;;  %v1161_v18 = vmul.f32 %v2002_v3, %v971_v54  ;;  %v1256_v19 = vsel %vm1124_vm1, %v1049_v14, %v1192_v15 }
 0x176   : > { %1320 = vst [vmem:[%s2011_s22 + $0x1c0] sm:$0xff] %v1256_v19  ;;  %v881_v24 = vpop.f32.mrf.mxu2  ;;  %v980_v20 = vpop.f32.mrf.mxu1 }
 0x177   : > { %v1225_v22 = vsel %vm1093_vm2, %v971_v54, %v1161_v18  ;;  %v882_v28 = vadd.f32 %v1993_v60, %v881_v24 }
 0x178   : > { %1289 = vst [vmem:[%s2011_s22 + $0xc8] sm:$0xff] %v1225_v22  ;;  %v804_v29 = vpop.f32.mrf.mxu0 }
 0x179   : > { %v805_v47 = vadd.f32 %v1993_v60, %v804_v29  ;;  %v1051_v33 = vadd.f32 %v1050_v10, %v882_v28 }
 0x17b   : > { %v974_v30 = vadd.f32 %v973_v55, %v805_v47  ;;  %vm1125_vm3 = vcmp.ge.f32.partialorder %v1051_v33, 0.0  ;;  %v1193_v31 = vmul.f32 %v2002_v3, %v1051_v33  ;;  %v1058_v56 = vpop.f32.mrf.mxu3 }
 0x17d   : > { %vm1094_vm4 = vcmp.ge.f32.partialorder %v974_v30, 0.0  ;;  %v1162_v46 = vmul.f32 %v2002_v3, %v974_v30  ;;  %v1257_v21 = vsel %vm1125_vm3, %v1051_v33, %v1193_v31 }
 0x17e   : > { %1321 = vst [vmem:[%s2011_s22 + $0x1c8] sm:$0xff] %v1257_v21  ;;  %v884_v35 = vpop.f32.mrf.mxu2  ;;  %v983_v39 = vpop.f32.mrf.mxu1 }
 0x17f   : > { %v1226_v5 = vsel %vm1094_vm4, %v974_v30, %v1162_v46  ;;  %v885_v60 = vadd.f32 %v2311_v36, %v884_v35 }
 0x180   : > { %1290 = vst [vmem:[%s2011_s22 + $0xd0] sm:$0xff] %v1226_v5  ;;  %v806_v32 = vpop.f32.mrf.mxu0 }
 0x181   : > { %v807_v38 = vadd.f32 %v2311_v36, %v806_v32  ;;  %v1054_v3 = vadd.f32 %v1053_v26, %v885_v60 }
 0x183   : > { %v976_v34 = vadd.f32 %v975_v1, %v807_v38  ;;  %vm1126_vm5 = vcmp.ge.f32.partialorder %v1054_v3, 0.0  ;;  %v1194_v42 = vmul.f32 %v2318_v41, %v1054_v3  ;;  %v1060_v23 = vpop.f32.mrf.mxu3 }
 0x185   : > { %vm1095_vm6 = vcmp.ge.f32.partialorder %v976_v34, 0.0  ;;  %v1163_v62 = vmul.f32 %v2318_v41, %v976_v34  ;;  %v1258_v37 = vsel %vm1126_vm5, %v1054_v3, %v1194_v42 }
 0x186   : > { %1322 = vst [vmem:[%s2011_s22 + $0x1d0] sm:$0xff] %v1258_v37  ;;  %v886_v48 = vpop.f32.mrf.mxu2  ;;  %v985_v43 = vpop.f32.mrf.mxu1 }
 0x187   : > { %v1227_v45 = vsel %vm1095_vm6, %v976_v34, %v1163_v62  ;;  %v887_v50 = vadd.f32 %v2311_v36, %v886_v48 }
 0x188   : > { %1291 = vst [vmem:[%s2011_s22 + $0xd8] sm:$0xff] %v1227_v45  ;;  %v809_v51 = vpop.f32.mrf.mxu0 }
 0x189   : > { %v810_v52 = vadd.f32 %v2311_v36, %v809_v51  ;;  %v1056_v55 = vadd.f32 %v1055_v40, %v887_v50 }
 0x18b   : > { %v979_v53 = vadd.f32 %v978_v17, %v810_v52  ;;  %vm1127_vm7 = vcmp.ge.f32.partialorder %v1056_v55, 0.0  ;;  %v1195_v16 = vmul.f32 %v2318_v41, %v1056_v55 }
 0x18d   : > { %vm1096_vm8 = vcmp.ge.f32.partialorder %v979_v53, 0.0  ;;  %v1164_v44 = vmul.f32 %v2318_v41, %v979_v53  ;;  %v1259_v57 = vsel %vm1127_vm7, %v1056_v55, %v1195_v16 }
 0x18e   : > { %1323 = vst [vmem:[%s2011_s22 + $0x1d8] sm:$0xff] %v1259_v57  ;;  %v889_v25 = vpop.f32.mrf.mxu2  ;;  %v988_v1 = vpop.f32.mrf.mxu1 }
 0x18f   : > { %v1228_v49 = vsel %vm1096_vm8, %v979_v53, %v1164_v44  ;;  %v890_v58 = vadd.f32 %v2311_v36, %v889_v25  ;;  %v989_v6 = vadd.f32 %v988_v1, %v820_v61 }
 0x190   : > { %1292 = vst [vmem:[%s2011_s22 + $0xe0] sm:$0xff] %v1228_v49  ;;  %v811_v63 = vpop.f32.mrf.mxu0 }
 0x191   : > { %v812_v0 = vadd.f32 %v2311_v36, %v811_v63  ;;  %v1059_v2 = vadd.f32 %v1058_v56, %v890_v58  ;;  %vm1100_vm10 = vcmp.ge.f32.partialorder %v989_v6, 0.0  ;;  %v1168_v10 = vmul.f32 %v2318_v41, %v989_v6 }
 0x193   : > { %v981_v8 = vadd.f32 %v980_v20, %v812_v0  ;;  %vm1128_vm9 = vcmp.ge.f32.partialorder %v1059_v2, 0.0  ;;  %v1196_v9 = vmul.f32 %v2318_v41, %v1059_v2  ;;  %v1232_v12 = vsel %vm1100_vm10, %v989_v6, %v1168_v10  ;;  %v1063_v20 = vpop.f32.mrf.mxu3 }
 0x194   : > { %1296 = vst [vmem:[%s2011_s22 + $0x100] sm:$0xff] %v1232_v12 }
 0x195   : > { %vm1097_vm0 = vcmp.ge.f32.partialorder %v981_v8, 0.0  ;;  %v1165_v11 = vmul.f32 %v2318_v41, %v981_v8  ;;  %v1260_v59 = vsel %vm1128_vm9, %v1059_v2, %v1196_v9 }
 0x196   : > { %1324 = vst [vmem:[%s2011_s22 + $0x1e0] sm:$0xff] %v1260_v59  ;;  %v891_v4 = vpop.f32.mrf.mxu2  ;;  %v990_v15 = vpop.f32.mrf.mxu1 }
 0x197   : > { %v1229_v13 = vsel %vm1097_vm0, %v981_v8, %v1165_v11  ;;  %v892_v17 = vadd.f32 %v2311_v36, %v891_v4  ;;  %v991_v19 = vadd.f32 %v990_v15, %v822_v7 }
 0x198   : > { %1293 = vst [vmem:[%s2011_s22 + $0xe8] sm:$0xff] %v1229_v13  ;;  %v814_v14 = vpop.f32.mrf.mxu0 }
 0x199   : > { %v815_v54 = vadd.f32 %v2311_v36, %v814_v14  ;;  %v1061_v18 = vadd.f32 %v1060_v23, %v892_v17  ;;  %vm1101_vm12 = vcmp.ge.f32.partialorder %v991_v19, 0.0  ;;  %v1169_v27 = vmul.f32 %v2318_v41, %v991_v19 }
 0x19b   : > { %v984_v22 = vadd.f32 %v983_v39, %v815_v54  ;;  %vm1129_vm11 = vcmp.ge.f32.partialorder %v1061_v18, 0.0  ;;  %v1197_v24 = vmul.f32 %v2318_v41, %v1061_v18  ;;  %v1233_v29 = vsel %vm1101_vm12, %v991_v19, %v1169_v27  ;;  %v1065_v3 = vpop.f32.mrf.mxu3 }
 0x19c   : > { %1297 = vst [vmem:[%s2011_s22 + $0x108] sm:$0xff] %v1233_v29 }
 0x19d   : > { %vm1098_vm13 = vcmp.ge.f32.partialorder %v984_v22, 0.0  ;;  %v1166_v26 = vmul.f32 %v2318_v41, %v984_v22  ;;  %v1261_v28 = vsel %vm1129_vm11, %v1061_v18, %v1197_v24 }
 0x19e   : > { %1325 = vst [vmem:[%s2011_s22 + $0x1e8] sm:$0xff] %v1261_v28  ;;  %v894_v33 = vpop.f32.mrf.mxu2 }
 0x19f   : > { %v1230_v47 = vsel %vm1098_vm13, %v984_v22, %v1166_v26  ;;  %v895_v30 = vadd.f32 %v2311_v36, %v894_v33 }
 0x1a0   : > { %1294 = vst [vmem:[%s2011_s22 + $0xf0] sm:$0xff] %v1230_v47  ;;  %v816_v31 = vpop.f32.mrf.mxu0 }
 0x1a1   : > { %v817_v46 = vadd.f32 %v2311_v36, %v816_v31  ;;  %v1064_v21 = vadd.f32 %v1063_v20, %v895_v30 }
 0x1a3   : > { %v986_v5 = vadd.f32 %v985_v43, %v817_v46  ;;  %vm1130_vm14 = vcmp.ge.f32.partialorder %v1064_v21, 0.0  ;;  %v1198_v35 = vmul.f32 %v2318_v41, %v1064_v21 }
 0x1a5   : > { %vm1099_vm15 = vcmp.ge.f32.partialorder %v986_v5, 0.0  ;;  %v1167_v60 = vmul.f32 %v2318_v41, %v986_v5  ;;  %v1262_v32 = vsel %vm1130_vm14, %v1064_v21, %v1198_v35 }
 0x1a6   : > { %1326 = vst [vmem:[%s2011_s22 + $0x1f0] sm:$0xff] %v1262_v32  ;;  %v896_v39 = vpop.f32.mrf.mxu2 }
 0x1a7   : > { %v1231_v38 = vsel %vm1099_vm15, %v986_v5, %v1167_v60  ;;  %v897_v40 = vadd.f32 %v2311_v36, %v896_v39 }
 0x1a8   : > { %1295 = vst [vmem:[%s2011_s22 + $0xf8] sm:$0xff] %v1231_v38 }
 0x1a9   : > { %v1066_v34 = vadd.f32 %v1065_v3, %v897_v40 }
 0x1ab   : > { %vm1131_vm1 = vcmp.ge.f32.partialorder %v1066_v34, 0.0  ;;  %v1199_v42 = vmul.f32 %v2318_v41, %v1066_v34 }
 0x1ad   : > { %v1263_v62 = vsel %vm1131_vm1, %v1066_v34, %v1199_v42 }
 0x1ae   : > { %1327 = vst [vmem:[%s2011_s22 + $0x1f8] sm:$0xff] %v1263_v62 }
 0x1af PF: > { %s14_s15 = sadd.s32 1, %s1821_s15  }
 0x1b0   : > { %p11_p4 = scmp.ge.s32.totalorder %s14_s15, 6  }
 0x1b2   :  { %13 = sbr.rel (!%p11_p4) target bundleno = 1 (0x1), region = 66 }

// kernel: up2_forward.5
= control target key start
LH: loop header
LB: loop body
LE: loop exit
PB: predicated region body
PF: predicated region fallthrough
CT: control target
= control target key end

     0   :  { %s1333_s15 = smov 0   ;;  %s1639_s0 = inlined_call_operand.vmem [shape: bf16[2048,72], index: 0, kind: input, shape index: {}]   ;;  %s1640_s1 = inlined_call_operand.vmem [shape: bf16[72,128], index: 1, kind: input, shape index: {}]   ;;  %s1641_s2 = inlined_call_operand.vmem [shape: f32[1,128], index: 2, kind: input, shape index: {}]   ;;  %s1642_s3 = inlined_call_operand.vmem [shape: f32[1,128], index: 3, kind: input, shape index: {}]   ;;  %s1643_s4 = inlined_call_operand.vmem [shape: f32[2048,128], index: 4, kind: output, shape index: {}]  }
   0x1 LB: > { %s1052_s16 = sadd.s32 4294967295, %s1306_s15   ;;  %p1056_p0 = scmp.ge.s32.totalorder %s1306_s15, 1  ;;  %s1306_s15 = sphi %s1333_s15, %s14_s15  }
   0x2   : > { %p163_p1 = scmp.lt.s32.totalorder %s1306_s15, 5 }
   0x4   : > { %p164_p2 = pnand %p1056_p0, %p163_p1 }
   0x5   : > { %s1057_s19 = sshll.u32 (!%p164_p2), %s1052_s16, 6 }
   0x6   : > { %167 = sbr.rel (%p164_p2) target bundleno = 296 (0x128), region = 36  ;;  %p190_p3 = scmp.lt.s32.totalorder (!%p164_p2), %s1057_s19, 255 }
   0xb   : > { %v274_v0 = vld [vmem:[%s1640_s1 + $0x20] sm:$0xf]  ;;  %vm563_vm0 = vcmask 1043456   ;;  %v1274_v4 = vld [vmem:[%s1640_s1 + $0x18] sm:$0xff]  ;;  %v1273_v5 = vld [vmem:[%s1640_s1 + $0x10] sm:$0xff]  ;;  %s1645_s19 = smov (!%p190_p3, %s1057_s19), 255 }
   0xc   : > { %v456_v1 = vunpack.c.l.b16 %v274_v0  ;;  %v1272_v6 = vld [vmem:[%s1640_s1 + $0x8] sm:$0xff]  ;;  %s1058_s26 = sshll.u32 %s1645_s19, 2  ;;  %v1271_v7 = vld [vmem:[%s1640_s1] sm:$0xff]  ;;  %vm466_vm1 = vcmask 588800   ;;  %s1060_s10 = sshll.u32 %s1645_s19, 3 }
   0xd   : > { %s1362_s5 = scalar_lea.vmem %s1639_s0, %s1058_s26  ;;  %v1431_v40 = vld [vmem:[%s1641_s2] ss:$0 sm:$0xff]  ;;  %s1444_s13 = scalar_lea.vmem %s1643_s4, %s1060_s10 }
   0xe   : > { %v461_v2 = vpack.c.b16 %v456_v1, %v456_v1  ;;  %v1239_v8 = vld [vmem:[%s1362_s5] sm:$0xff]  ;;  %v1240_v12 = vld [vmem:[%s1362_s5 + $0x8] sm:$0xff]  ;;  %v1241_v16 = vld [vmem:[%s1362_s5 + $0x10] sm:$0xff] }
   0xf   : > { %v1247_v9 = vld [vmem:[%s1362_s5 + $0x40] sm:$0xff]  ;;  %v1248_v13 = vld [vmem:[%s1362_s5 + $0x48] sm:$0xff]  ;;  %v1249_v17 = vld [vmem:[%s1362_s5 + $0x50] sm:$0xff] }
  0x10   : > { %v565_v3 = vsel %vm563_vm0, %v461_v2, 0  ;;  %v1255_v10 = vld [vmem:[%s1362_s5 + $0x80] sm:$0xff]  ;;  %v1256_v14 = vld [vmem:[%s1362_s5 + $0x88] sm:$0xff]  ;;  %v1257_v18 = vld [vmem:[%s1362_s5 + $0x90] sm:$0xff] }
  0x11   : > { %570 = vmatpush.bf16.msra.mxu0 %v565_v3  ;;  %1275 = vmatpush.bf16.msra.mxu1 %v565_v3  ;;  %v1263_v11 = vld [vmem:[%s1362_s5 + $0xc0] sm:$0xff]  ;;  %v1264_v15 = vld [vmem:[%s1362_s5 + $0xc8] sm:$0xff]  ;;  %v1265_v19 = vld [vmem:[%s1362_s5 + $0xd0] sm:$0xff] }
  0x12   : > { %1276 = vmatpush.bf16.msra.mxu2 %v565_v3  ;;  %1277 = vmatpush.bf16.msra.mxu3 %v565_v3  ;;  %v1242_v20 = vld [vmem:[%s1362_s5 + $0x18] sm:$0xff]  ;;  %v1243_v24 = vld [vmem:[%s1362_s5 + $0x20] sm:$0xff]  ;;  %v1244_v28 = vld [vmem:[%s1362_s5 + $0x28] sm:$0xff] }
  0x13   : > { %v1250_v21 = vld [vmem:[%s1362_s5 + $0x58] sm:$0xff]  ;;  %v1251_v25 = vld [vmem:[%s1362_s5 + $0x60] sm:$0xff]  ;;  %v1252_v29 = vld [vmem:[%s1362_s5 + $0x68] sm:$0xff] }
  0x14   : > { %v1258_v22 = vld [vmem:[%s1362_s5 + $0x98] sm:$0xff]  ;;  %v1259_v26 = vld [vmem:[%s1362_s5 + $0xa0] sm:$0xff]  ;;  %v1260_v30 = vld [vmem:[%s1362_s5 + $0xa8] sm:$0xff] }
  0x15   : > { %571 = vmatpush.bf16.msra.mxu0 %v1274_v4  ;;  %1278 = vmatpush.bf16.msra.mxu1 %v1274_v4  ;;  %v1266_v23 = vld [vmem:[%s1362_s5 + $0xd8] sm:$0xff]  ;;  %v1267_v27 = vld [vmem:[%s1362_s5 + $0xe0] sm:$0xff]  ;;  %v1268_v31 = vld [vmem:[%s1362_s5 + $0xe8] sm:$0xff] }
  0x16   : > { %1279 = vmatpush.bf16.msra.mxu2 %v1274_v4  ;;  %1280 = vmatpush.bf16.msra.mxu3 %v1274_v4  ;;  %v1245_v32 = vld [vmem:[%s1362_s5 + $0x30] sm:$0xff]  ;;  %v1246_v36 = vld [vmem:[%s1362_s5 + $0x38] sm:$0xff]  ;;  %v1436_v41 = vld [vmem:[%s1642_s3] ss:$0 sm:$0xff] }
  0x17   : > { %v1253_v33 = vld [vmem:[%s1362_s5 + $0x70] sm:$0xff]  ;;  %v1254_v37 = vld [vmem:[%s1362_s5 + $0x78] sm:$0xff] }
  0x18   : > { %v1261_v34 = vld [vmem:[%s1362_s5 + $0xb0] sm:$0xff]  ;;  %v1262_v38 = vld [vmem:[%s1362_s5 + $0xb8] sm:$0xff] }
  0x19   : > { %572 = vmatpush.bf16.msra.mxu0 %v1273_v5  ;;  %1281 = vmatpush.bf16.msra.mxu1 %v1273_v5  ;;  %v1269_v35 = vld [vmem:[%s1362_s5 + $0xf0] sm:$0xff]  ;;  %v1270_v39 = vld [vmem:[%s1362_s5 + $0xf8] sm:$0xff] }
  0x1a   : > { %1282 = vmatpush.bf16.msra.mxu2 %v1273_v5  ;;  %1283 = vmatpush.bf16.msra.mxu3 %v1273_v5 }
  0x1d   : > { %573 = vmatpush.bf16.msra.mxu0 %v1272_v6  ;;  %1284 = vmatpush.bf16.msra.mxu1 %v1272_v6 }
  0x1e   : > { %1285 = vmatpush.bf16.msra.mxu2 %v1272_v6  ;;  %1286 = vmatpush.bf16.msra.mxu3 %v1272_v6 }
  0x21   : > { %574 = vmatpush.bf16.msra.mxu0 %v1271_v7  ;;  %1287 = vmatpush.bf16.msra.mxu1 %v1271_v7 }
  0x22   : > { %1288 = vmatpush.bf16.msra.mxu2 %v1271_v7  ;;  %1289 = vmatpush.bf16.msra.mxu3 %v1271_v7 }
  0x24   : > { %1205 = vmatmul.msk.bf16.vlgmr.msra.gmra.mxu0 %vm466_vm1, %v1239_v8  ;;  %1213 = vmatmul.msk.bf16.vlgmr.msra.gmra.mxu1 %vm466_vm1, %v1247_v9 }
  0x25   : > { %1221 = vmatmul.msk.bf16.vlgmr.msra.gmra.mxu2 %vm466_vm1, %v1255_v10  ;;  %1229 = vmatmul.msk.bf16.vlgmr.msra.gmra.mxu3 %vm466_vm1, %v1263_v11 }
  0x34   : > { %1206 = vmatmul.msk.bf16.gmra.mxu0 %vm466_vm1, %v1240_v12  ;;  %1214 = vmatmul.msk.bf16.gmra.mxu1 %vm466_vm1, %v1248_v13 }
  0x35   : > { %1222 = vmatmul.msk.bf16.gmra.mxu2 %vm466_vm1, %v1256_v14  ;;  %1230 = vmatmul.msk.bf16.gmra.mxu3 %vm466_vm1, %v1264_v15 }
  0x44   : > { %1207 = vmatmul.msk.bf16.gmra.mxu0 %vm466_vm1, %v1241_v16  ;;  %1215 = vmatmul.msk.bf16.gmra.mxu1 %vm466_vm1, %v1249_v17 }
  0x45   : > { %1223 = vmatmul.msk.bf16.gmra.mxu2 %vm466_vm1, %v1257_v18  ;;  %1231 = vmatmul.msk.bf16.gmra.mxu3 %vm466_vm1, %v1265_v19 }
  0x54   : > { %1208 = vmatmul.msk.bf16.gmra.mxu0 %vm466_vm1, %v1242_v20  ;;  %1216 = vmatmul.msk.bf16.gmra.mxu1 %vm466_vm1, %v1250_v21 }
  0x55   : > { %1224 = vmatmul.msk.bf16.gmra.mxu2 %vm466_vm1, %v1258_v22  ;;  %1232 = vmatmul.msk.bf16.gmra.mxu3 %vm466_vm1, %v1266_v23 }
  0x64   : > { %1209 = vmatmul.msk.bf16.gmra.mxu0 %vm466_vm1, %v1243_v24  ;;  %1217 = vmatmul.msk.bf16.gmra.mxu1 %vm466_vm1, %v1251_v25 }
  0x65   : > { %1225 = vmatmul.msk.bf16.gmra.mxu2 %vm466_vm1, %v1259_v26  ;;  %1233 = vmatmul.msk.bf16.gmra.mxu3 %vm466_vm1, %v1267_v27 }
  0x74   : > { %1210 = vmatmul.msk.bf16.gmra.mxu0 %vm466_vm1, %v1244_v28  ;;  %1218 = vmatmul.msk.bf16.gmra.mxu1 %vm466_vm1, %v1252_v29 }
  0x75   : > { %1226 = vmatmul.msk.bf16.gmra.mxu2 %vm466_vm1, %v1260_v30  ;;  %1234 = vmatmul.msk.bf16.gmra.mxu3 %vm466_vm1, %v1268_v31 }
  0x84   : > { %1211 = vmatmul.msk.bf16.gmra.mxu0 %vm466_vm1, %v1245_v32  ;;  %1219 = vmatmul.msk.bf16.gmra.mxu1 %vm466_vm1, %v1253_v33 }
  0x85   : > { %1227 = vmatmul.msk.bf16.gmra.mxu2 %vm466_vm1, %v1261_v34  ;;  %1235 = vmatmul.msk.bf16.gmra.mxu3 %vm466_vm1, %v1269_v35 }
  0x94   : > { %1212 = vmatmul.msk.bf16.gmra.mxu0 %vm466_vm1, %v1246_v36  ;;  %1220 = vmatmul.msk.bf16.gmra.mxu1 %vm466_vm1, %v1254_v37 }
  0x95   : > { %1228 = vmatmul.msk.bf16.gmra.mxu2 %vm466_vm1, %v1262_v38  ;;  %1236 = vmatmul.msk.bf16.gmra.mxu3 %vm466_vm1, %v1270_v39 }
  0xa1   : > { %v576_v42 = vpop.f32.mrf.mxu0  ;;  %v616_v43 = vpop.f32.mrf.mxu1 }
  0xa2   : > { %v577_v44 = vadd.f32 %v1431_v40, %v576_v42  ;;  %v617_v45 = vadd.f32 %v1431_v40, %v616_v43 }
  0xa4   : > { %vm736_vm2 = vcmp.ge.f32.partialorder %v577_v44, 0.0  ;;  %v804_v46 = vmul.f32 %v1436_v41, %v577_v44  ;;  %vm752_vm3 = vcmp.ge.f32.partialorder %v617_v45, 0.0  ;;  %v820_v47 = vmul.f32 %v1436_v41, %v617_v45 }
  0xa6   : > { %v868_v48 = vsel %vm736_vm2, %v577_v44, %v804_v46  ;;  %v884_v49 = vsel %vm752_vm3, %v617_v45, %v820_v47 }
  0xa7   : > { %932 = vst [vmem:[%s1444_s13] sm:$0xff] %v868_v48 }
  0xa8   : > { %948 = vst [vmem:[%s1444_s13 + $0x80] sm:$0xff] %v884_v49  ;;  %v656_v50 = vpop.f32.mrf.mxu2  ;;  %v696_v51 = vpop.f32.mrf.mxu3 }
  0xa9   : > { %v657_v52 = vadd.f32 %v1431_v40, %v656_v50  ;;  %v697_v53 = vadd.f32 %v1431_v40, %v696_v51  ;;  %v578_v54 = vpop.f32.mrf.mxu0  ;;  %v618_v55 = vpop.f32.mrf.mxu1 }
  0xaa   : > { %v579_v56 = vadd.f32 %v1431_v40, %v578_v54  ;;  %v619_v57 = vadd.f32 %v1431_v40, %v618_v55 }
  0xab   : > { %vm768_vm4 = vcmp.ge.f32.partialorder %v657_v52, 0.0  ;;  %v836_v58 = vmul.f32 %v1436_v41, %v657_v52  ;;  %vm784_vm5 = vcmp.ge.f32.partialorder %v697_v53, 0.0  ;;  %v852_v59 = vmul.f32 %v1436_v41, %v697_v53 }
  0xac   : > { %vm737_vm6 = vcmp.ge.f32.partialorder %v579_v56, 0.0  ;;  %v805_v60 = vmul.f32 %v1436_v41, %v579_v56  ;;  %vm753_vm7 = vcmp.ge.f32.partialorder %v619_v57, 0.0  ;;  %v821_v61 = vmul.f32 %v1436_v41, %v619_v57 }
  0xad   : > { %v900_v62 = vsel %vm768_vm4, %v657_v52, %v836_v58  ;;  %v916_v63 = vsel %vm784_vm5, %v697_v53, %v852_v59 }
  0xae   : > { %964 = vst [vmem:[%s1444_s13 + $0x100] sm:$0xff] %v900_v62  ;;  %v869_v0 = vsel %vm737_vm6, %v579_v56, %v805_v60  ;;  %v885_v1 = vsel %vm753_vm7, %v619_v57, %v821_v61 }
  0xaf   : > { %980 = vst [vmem:[%s1444_s13 + $0x180] sm:$0xff] %v916_v63 }
  0xb0   : > { %933 = vst [vmem:[%s1444_s13 + $0x8] sm:$0xff] %v869_v0  ;;  %v658_v2 = vpop.f32.mrf.mxu2  ;;  %v698_v3 = vpop.f32.mrf.mxu3 }
  0xb1   : > { %949 = vst [vmem:[%s1444_s13 + $0x88] sm:$0xff] %v885_v1  ;;  %v659_v4 = vadd.f32 %v1431_v40, %v658_v2  ;;  %v699_v5 = vadd.f32 %v1431_v40, %v698_v3  ;;  %v581_v6 = vpop.f32.mrf.mxu0  ;;  %v621_v7 = vpop.f32.mrf.mxu1 }
  0xb2   : > { %v582_v8 = vadd.f32 %v1431_v40, %v581_v6  ;;  %v622_v9 = vadd.f32 %v1431_v40, %v621_v7 }
  0xb3   : > { %vm769_vm8 = vcmp.ge.f32.partialorder %v659_v4, 0.0  ;;  %v837_v10 = vmul.f32 %v1436_v41, %v659_v4  ;;  %vm785_vm9 = vcmp.ge.f32.partialorder %v699_v5, 0.0  ;;  %v853_v11 = vmul.f32 %v1436_v41, %v699_v5 }
  0xb4   : > { %vm738_vm10 = vcmp.ge.f32.partialorder %v582_v8, 0.0  ;;  %v806_v12 = vmul.f32 %v1436_v41, %v582_v8  ;;  %vm754_vm11 = vcmp.ge.f32.partialorder %v622_v9, 0.0  ;;  %v822_v13 = vmul.f32 %v1436_v41, %v622_v9 }
  0xb5   : > { %v901_v14 = vsel %vm769_vm8, %v659_v4, %v837_v10  ;;  %v917_v15 = vsel %vm785_vm9, %v699_v5, %v853_v11 }
  0xb6   : > { %965 = vst [vmem:[%s1444_s13 + $0x108] sm:$0xff] %v901_v14  ;;  %v870_v16 = vsel %vm738_vm10, %v582_v8, %v806_v12  ;;  %v886_v17 = vsel %vm754_vm11, %v622_v9, %v822_v13 }
  0xb7   : > { %981 = vst [vmem:[%s1444_s13 + $0x188] sm:$0xff] %v917_v15 }
  0xb8   : > { %934 = vst [vmem:[%s1444_s13 + $0x10] sm:$0xff] %v870_v16  ;;  %v661_v18 = vpop.f32.mrf.mxu2  ;;  %v701_v19 = vpop.f32.mrf.mxu3 }
  0xb9   : > { %950 = vst [vmem:[%s1444_s13 + $0x90] sm:$0xff] %v886_v17  ;;  %v662_v20 = vadd.f32 %v1431_v40, %v661_v18  ;;  %v702_v21 = vadd.f32 %v1431_v40, %v701_v19  ;;  %v583_v22 = vpop.f32.mrf.mxu0  ;;  %v623_v23 = vpop.f32.mrf.mxu1 }
  0xba   : > { %v584_v24 = vadd.f32 %v1431_v40, %v583_v22  ;;  %v624_v25 = vadd.f32 %v1431_v40, %v623_v23 }
  0xbb   : > { %vm770_vm12 = vcmp.ge.f32.partialorder %v662_v20, 0.0  ;;  %v838_v26 = vmul.f32 %v1436_v41, %v662_v20  ;;  %vm786_vm13 = vcmp.ge.f32.partialorder %v702_v21, 0.0  ;;  %v854_v27 = vmul.f32 %v1436_v41, %v702_v21 }
  0xbc   : > { %vm739_vm14 = vcmp.ge.f32.partialorder %v584_v24, 0.0  ;;  %v807_v28 = vmul.f32 %v1436_v41, %v584_v24  ;;  %vm755_vm15 = vcmp.ge.f32.partialorder %v624_v25, 0.0  ;;  %v823_v29 = vmul.f32 %v1436_v41, %v624_v25 }
  0xbd   : > { %v902_v30 = vsel %vm770_vm12, %v662_v20, %v838_v26  ;;  %v918_v31 = vsel %vm786_vm13, %v702_v21, %v854_v27 }
  0xbe   : > { %966 = vst [vmem:[%s1444_s13 + $0x110] sm:$0xff] %v902_v30  ;;  %v871_v32 = vsel %vm739_vm14, %v584_v24, %v807_v28  ;;  %v887_v33 = vsel %vm755_vm15, %v624_v25, %v823_v29 }
  0xbf   : > { %982 = vst [vmem:[%s1444_s13 + $0x190] sm:$0xff] %v918_v31 }
  0xc0   : > { %935 = vst [vmem:[%s1444_s13 + $0x18] sm:$0xff] %v871_v32  ;;  %v663_v34 = vpop.f32.mrf.mxu2  ;;  %v703_v35 = vpop.f32.mrf.mxu3 }
  0xc1   : > { %951 = vst [vmem:[%s1444_s13 + $0x98] sm:$0xff] %v887_v33  ;;  %v664_v36 = vadd.f32 %v1431_v40, %v663_v34  ;;  %v704_v37 = vadd.f32 %v1431_v40, %v703_v35  ;;  %v586_v38 = vpop.f32.mrf.mxu0  ;;  %v626_v39 = vpop.f32.mrf.mxu1 }
  0xc2   : > { %v587_v42 = vadd.f32 %v1431_v40, %v586_v38  ;;  %v627_v43 = vadd.f32 %v1431_v40, %v626_v39 }
  0xc3   : > { %vm771_vm0 = vcmp.ge.f32.partialorder %v664_v36, 0.0  ;;  %v839_v44 = vmul.f32 %v1436_v41, %v664_v36  ;;  %vm787_vm1 = vcmp.ge.f32.partialorder %v704_v37, 0.0  ;;  %v855_v45 = vmul.f32 %v1436_v41, %v704_v37 }
  0xc4   : > { %vm740_vm2 = vcmp.ge.f32.partialorder %v587_v42, 0.0  ;;  %v808_v46 = vmul.f32 %v1436_v41, %v587_v42  ;;  %vm756_vm3 = vcmp.ge.f32.partialorder %v627_v43, 0.0  ;;  %v824_v47 = vmul.f32 %v1436_v41, %v627_v43 }
  0xc5   : > { %v903_v48 = vsel %vm771_vm0, %v664_v36, %v839_v44  ;;  %v919_v49 = vsel %vm787_vm1, %v704_v37, %v855_v45 }
  0xc6   : > { %967 = vst [vmem:[%s1444_s13 + $0x118] sm:$0xff] %v903_v48  ;;  %v872_v50 = vsel %vm740_vm2, %v587_v42, %v808_v46  ;;  %v888_v51 = vsel %vm756_vm3, %v627_v43, %v824_v47 }
  0xc7   : > { %983 = vst [vmem:[%s1444_s13 + $0x198] sm:$0xff] %v919_v49 }
  0xc8   : > { %936 = vst [vmem:[%s1444_s13 + $0x20] sm:$0xff] %v872_v50  ;;  %v666_v52 = vpop.f32.mrf.mxu2  ;;  %v706_v53 = vpop.f32.mrf.mxu3 }
  0xc9   : > { %952 = vst [vmem:[%s1444_s13 + $0xa0] sm:$0xff] %v888_v51  ;;  %v667_v54 = vadd.f32 %v1431_v40, %v666_v52  ;;  %v707_v55 = vadd.f32 %v1431_v40, %v706_v53  ;;  %v588_v56 = vpop.f32.mrf.mxu0  ;;  %v628_v57 = vpop.f32.mrf.mxu1 }
  0xca   : > { %v589_v58 = vadd.f32 %v1431_v40, %v588_v56  ;;  %v629_v59 = vadd.f32 %v1431_v40, %v628_v57 }
  0xcb   : > { %vm772_vm4 = vcmp.ge.f32.partialorder %v667_v54, 0.0  ;;  %v840_v60 = vmul.f32 %v1436_v41, %v667_v54  ;;  %vm788_vm5 = vcmp.ge.f32.partialorder %v707_v55, 0.0  ;;  %v856_v61 = vmul.f32 %v1436_v41, %v707_v55 }
  0xcc   : > { %vm741_vm6 = vcmp.ge.f32.partialorder %v589_v58, 0.0  ;;  %v809_v62 = vmul.f32 %v1436_v41, %v589_v58  ;;  %vm757_vm7 = vcmp.ge.f32.partialorder %v629_v59, 0.0  ;;  %v825_v63 = vmul.f32 %v1436_v41, %v629_v59 }
  0xcd   : > { %v904_v0 = vsel %vm772_vm4, %v667_v54, %v840_v60  ;;  %v920_v1 = vsel %vm788_vm5, %v707_v55, %v856_v61 }
  0xce   : > { %968 = vst [vmem:[%s1444_s13 + $0x120] sm:$0xff] %v904_v0  ;;  %v873_v2 = vsel %vm741_vm6, %v589_v58, %v809_v62  ;;  %v889_v3 = vsel %vm757_vm7, %v629_v59, %v825_v63 }
  0xcf   : > { %984 = vst [vmem:[%s1444_s13 + $0x1a0] sm:$0xff] %v920_v1 }
  0xd0   : > { %937 = vst [vmem:[%s1444_s13 + $0x28] sm:$0xff] %v873_v2  ;;  %v668_v4 = vpop.f32.mrf.mxu2  ;;  %v708_v5 = vpop.f32.mrf.mxu3 }
  0xd1   : > { %953 = vst [vmem:[%s1444_s13 + $0xa8] sm:$0xff] %v889_v3  ;;  %v669_v6 = vadd.f32 %v1431_v40, %v668_v4  ;;  %v709_v7 = vadd.f32 %v1431_v40, %v708_v5  ;;  %v591_v8 = vpop.f32.mrf.mxu0  ;;  %v631_v9 = vpop.f32.mrf.mxu1 }
  0xd2   : > { %v592_v10 = vadd.f32 %v1431_v40, %v591_v8  ;;  %v632_v11 = vadd.f32 %v1431_v40, %v631_v9 }
  0xd3   : > { %vm773_vm8 = vcmp.ge.f32.partialorder %v669_v6, 0.0  ;;  %v841_v12 = vmul.f32 %v1436_v41, %v669_v6  ;;  %vm789_vm9 = vcmp.ge.f32.partialorder %v709_v7, 0.0  ;;  %v857_v13 = vmul.f32 %v1436_v41, %v709_v7 }
  0xd4   : > { %vm742_vm10 = vcmp.ge.f32.partialorder %v592_v10, 0.0  ;;  %v810_v14 = vmul.f32 %v1436_v41, %v592_v10  ;;  %vm758_vm11 = vcmp.ge.f32.partialorder %v632_v11, 0.0  ;;  %v826_v15 = vmul.f32 %v1436_v41, %v632_v11 }
  0xd5   : > { %v905_v16 = vsel %vm773_vm8, %v669_v6, %v841_v12  ;;  %v921_v17 = vsel %vm789_vm9, %v709_v7, %v857_v13 }
  0xd6   : > { %969 = vst [vmem:[%s1444_s13 + $0x128] sm:$0xff] %v905_v16  ;;  %v874_v18 = vsel %vm742_vm10, %v592_v10, %v810_v14  ;;  %v890_v19 = vsel %vm758_vm11, %v632_v11, %v826_v15 }
  0xd7   : > { %985 = vst [vmem:[%s1444_s13 + $0x1a8] sm:$0xff] %v921_v17 }
  0xd8   : > { %938 = vst [vmem:[%s1444_s13 + $0x30] sm:$0xff] %v874_v18  ;;  %v671_v20 = vpop.f32.mrf.mxu2  ;;  %v711_v21 = vpop.f32.mrf.mxu3 }
  0xd9   : > { %954 = vst [vmem:[%s1444_s13 + $0xb0] sm:$0xff] %v890_v19  ;;  %v672_v22 = vadd.f32 %v1431_v40, %v671_v20  ;;  %v712_v23 = vadd.f32 %v1431_v40, %v711_v21  ;;  %v593_v24 = vpop.f32.mrf.mxu0  ;;  %v633_v25 = vpop.f32.mrf.mxu1 }
  0xda   : > { %v594_v26 = vadd.f32 %v1431_v40, %v593_v24  ;;  %v634_v27 = vadd.f32 %v1431_v40, %v633_v25 }
  0xdb   : > { %vm774_vm12 = vcmp.ge.f32.partialorder %v672_v22, 0.0  ;;  %v842_v28 = vmul.f32 %v1436_v41, %v672_v22  ;;  %vm790_vm13 = vcmp.ge.f32.partialorder %v712_v23, 0.0  ;;  %v858_v29 = vmul.f32 %v1436_v41, %v712_v23 }
  0xdc   : > { %vm743_vm14 = vcmp.ge.f32.partialorder %v594_v26, 0.0  ;;  %v811_v30 = vmul.f32 %v1436_v41, %v594_v26  ;;  %vm759_vm15 = vcmp.ge.f32.partialorder %v634_v27, 0.0  ;;  %v827_v31 = vmul.f32 %v1436_v41, %v634_v27 }
  0xdd   : > { %v906_v32 = vsel %vm774_vm12, %v672_v22, %v842_v28  ;;  %v922_v33 = vsel %vm790_vm13, %v712_v23, %v858_v29 }
  0xde   : > { %970 = vst [vmem:[%s1444_s13 + $0x130] sm:$0xff] %v906_v32  ;;  %v875_v34 = vsel %vm743_vm14, %v594_v26, %v811_v30  ;;  %v891_v35 = vsel %vm759_vm15, %v634_v27, %v827_v31 }
  0xdf   : > { %986 = vst [vmem:[%s1444_s13 + $0x1b0] sm:$0xff] %v922_v33 }
  0xe0   : > { %939 = vst [vmem:[%s1444_s13 + $0x38] sm:$0xff] %v875_v34  ;;  %v673_v36 = vpop.f32.mrf.mxu2  ;;  %v713_v37 = vpop.f32.mrf.mxu3 }
  0xe1   : > { %955 = vst [vmem:[%s1444_s13 + $0xb8] sm:$0xff] %v891_v35  ;;  %v674_v38 = vadd.f32 %v1431_v40, %v673_v36  ;;  %v714_v39 = vadd.f32 %v1431_v40, %v713_v37  ;;  %v596_v42 = vpop.f32.mrf.mxu0  ;;  %v636_v43 = vpop.f32.mrf.mxu1 }
  0xe2   : > { %v597_v44 = vadd.f32 %v1431_v40, %v596_v42  ;;  %v637_v45 = vadd.f32 %v1431_v40, %v636_v43 }
  0xe3   : > { %vm775_vm0 = vcmp.ge.f32.partialorder %v674_v38, 0.0  ;;  %v843_v46 = vmul.f32 %v1436_v41, %v674_v38  ;;  %vm791_vm1 = vcmp.ge.f32.partialorder %v714_v39, 0.0  ;;  %v859_v47 = vmul.f32 %v1436_v41, %v714_v39 }
  0xe4   : > { %vm744_vm2 = vcmp.ge.f32.partialorder %v597_v44, 0.0  ;;  %v812_v48 = vmul.f32 %v1436_v41, %v597_v44  ;;  %vm760_vm3 = vcmp.ge.f32.partialorder %v637_v45, 0.0  ;;  %v828_v49 = vmul.f32 %v1436_v41, %v637_v45 }
  0xe5   : > { %v907_v50 = vsel %vm775_vm0, %v674_v38, %v843_v46  ;;  %v923_v51 = vsel %vm791_vm1, %v714_v39, %v859_v47 }
  0xe6   : > { %971 = vst [vmem:[%s1444_s13 + $0x138] sm:$0xff] %v907_v50  ;;  %v876_v52 = vsel %vm744_vm2, %v597_v44, %v812_v48  ;;  %v892_v53 = vsel %vm760_vm3, %v637_v45, %v828_v49 }
  0xe7   : > { %987 = vst [vmem:[%s1444_s13 + $0x1b8] sm:$0xff] %v923_v51 }
  0xe8   : > { %940 = vst [vmem:[%s1444_s13 + $0x40] sm:$0xff] %v876_v52  ;;  %v676_v54 = vpop.f32.mrf.mxu2  ;;  %v716_v55 = vpop.f32.mrf.mxu3 }
  0xe9   : > { %956 = vst [vmem:[%s1444_s13 + $0xc0] sm:$0xff] %v892_v53  ;;  %v677_v56 = vadd.f32 %v1431_v40, %v676_v54  ;;  %v717_v57 = vadd.f32 %v1431_v40, %v716_v55  ;;  %v598_v58 = vpop.f32.mrf.mxu0  ;;  %v638_v59 = vpop.f32.mrf.mxu1 }
  0xea   : > { %v599_v60 = vadd.f32 %v1431_v40, %v598_v58  ;;  %v639_v61 = vadd.f32 %v1431_v40, %v638_v59 }
  0xeb   : > { %vm776_vm4 = vcmp.ge.f32.partialorder %v677_v56, 0.0  ;;  %v844_v62 = vmul.f32 %v1436_v41, %v677_v56  ;;  %vm792_vm5 = vcmp.ge.f32.partialorder %v717_v57, 0.0  ;;  %v860_v63 = vmul.f32 %v1436_v41, %v717_v57 }
  0xec   : > { %vm745_vm6 = vcmp.ge.f32.partialorder %v599_v60, 0.0  ;;  %v813_v0 = vmul.f32 %v1436_v41, %v599_v60  ;;  %vm761_vm7 = vcmp.ge.f32.partialorder %v639_v61, 0.0  ;;  %v829_v1 = vmul.f32 %v1436_v41, %v639_v61 }
  0xed   : > { %v908_v2 = vsel %vm776_vm4, %v677_v56, %v844_v62  ;;  %v924_v3 = vsel %vm792_vm5, %v717_v57, %v860_v63 }
  0xee   : > { %972 = vst [vmem:[%s1444_s13 + $0x140] sm:$0xff] %v908_v2  ;;  %v877_v4 = vsel %vm745_vm6, %v599_v60, %v813_v0  ;;  %v893_v5 = vsel %vm761_vm7, %v639_v61, %v829_v1 }
  0xef   : > { %988 = vst [vmem:[%s1444_s13 + $0x1c0] sm:$0xff] %v924_v3 }
  0xf0   : > { %941 = vst [vmem:[%s1444_s13 + $0x48] sm:$0xff] %v877_v4  ;;  %v678_v6 = vpop.f32.mrf.mxu2  ;;  %v718_v7 = vpop.f32.mrf.mxu3 }
  0xf1   : > { %957 = vst [vmem:[%s1444_s13 + $0xc8] sm:$0xff] %v893_v5  ;;  %v679_v8 = vadd.f32 %v1431_v40, %v678_v6  ;;  %v719_v9 = vadd.f32 %v1431_v40, %v718_v7  ;;  %v601_v10 = vpop.f32.mrf.mxu0  ;;  %v641_v11 = vpop.f32.mrf.mxu1 }
  0xf2   : > { %v602_v12 = vadd.f32 %v1431_v40, %v601_v10  ;;  %v642_v13 = vadd.f32 %v1431_v40, %v641_v11 }
  0xf3   : > { %vm777_vm8 = vcmp.ge.f32.partialorder %v679_v8, 0.0  ;;  %v845_v14 = vmul.f32 %v1436_v41, %v679_v8  ;;  %vm793_vm9 = vcmp.ge.f32.partialorder %v719_v9, 0.0  ;;  %v861_v15 = vmul.f32 %v1436_v41, %v719_v9 }
  0xf4   : > { %vm746_vm10 = vcmp.ge.f32.partialorder %v602_v12, 0.0  ;;  %v814_v16 = vmul.f32 %v1436_v41, %v602_v12  ;;  %vm762_vm11 = vcmp.ge.f32.partialorder %v642_v13, 0.0  ;;  %v830_v17 = vmul.f32 %v1436_v41, %v642_v13 }
  0xf5   : > { %v909_v18 = vsel %vm777_vm8, %v679_v8, %v845_v14  ;;  %v925_v19 = vsel %vm793_vm9, %v719_v9, %v861_v15 }
  0xf6   : > { %973 = vst [vmem:[%s1444_s13 + $0x148] sm:$0xff] %v909_v18  ;;  %v878_v20 = vsel %vm746_vm10, %v602_v12, %v814_v16  ;;  %v894_v21 = vsel %vm762_vm11, %v642_v13, %v830_v17 }
  0xf7   : > { %989 = vst [vmem:[%s1444_s13 + $0x1c8] sm:$0xff] %v925_v19 }
  0xf8   : > { %942 = vst [vmem:[%s1444_s13 + $0x50] sm:$0xff] %v878_v20  ;;  %v681_v22 = vpop.f32.mrf.mxu2  ;;  %v721_v23 = vpop.f32.mrf.mxu3 }
  0xf9   : > { %958 = vst [vmem:[%s1444_s13 + $0xd0] sm:$0xff] %v894_v21  ;;  %v682_v24 = vadd.f32 %v1431_v40, %v681_v22  ;;  %v722_v25 = vadd.f32 %v1431_v40, %v721_v23  ;;  %v603_v26 = vpop.f32.mrf.mxu0  ;;  %v643_v27 = vpop.f32.mrf.mxu1 }
  0xfa   : > { %v604_v28 = vadd.f32 %v1431_v40, %v603_v26  ;;  %v644_v29 = vadd.f32 %v1431_v40, %v643_v27 }
  0xfb   : > { %vm778_vm12 = vcmp.ge.f32.partialorder %v682_v24, 0.0  ;;  %v846_v30 = vmul.f32 %v1436_v41, %v682_v24  ;;  %vm794_vm13 = vcmp.ge.f32.partialorder %v722_v25, 0.0  ;;  %v862_v31 = vmul.f32 %v1436_v41, %v722_v25 }
  0xfc   : > { %vm747_vm14 = vcmp.ge.f32.partialorder %v604_v28, 0.0  ;;  %v815_v32 = vmul.f32 %v1436_v41, %v604_v28  ;;  %vm763_vm15 = vcmp.ge.f32.partialorder %v644_v29, 0.0  ;;  %v831_v33 = vmul.f32 %v1436_v41, %v644_v29 }
  0xfd   : > { %v910_v34 = vsel %vm778_vm12, %v682_v24, %v846_v30  ;;  %v926_v35 = vsel %vm794_vm13, %v722_v25, %v862_v31 }
  0xfe   : > { %974 = vst [vmem:[%s1444_s13 + $0x150] sm:$0xff] %v910_v34  ;;  %v879_v36 = vsel %vm747_vm14, %v604_v28, %v815_v32  ;;  %v895_v37 = vsel %vm763_vm15, %v644_v29, %v831_v33 }
  0xff   : > { %990 = vst [vmem:[%s1444_s13 + $0x1d0] sm:$0xff] %v926_v35 }
 0x100   : > { %943 = vst [vmem:[%s1444_s13 + $0x58] sm:$0xff] %v879_v36  ;;  %v683_v38 = vpop.f32.mrf.mxu2  ;;  %v723_v39 = vpop.f32.mrf.mxu3 }
 0x101   : > { %959 = vst [vmem:[%s1444_s13 + $0xd8] sm:$0xff] %v895_v37  ;;  %v684_v42 = vadd.f32 %v1431_v40, %v683_v38  ;;  %v724_v43 = vadd.f32 %v1431_v40, %v723_v39  ;;  %v606_v44 = vpop.f32.mrf.mxu0  ;;  %v646_v45 = vpop.f32.mrf.mxu1 }
 0x102   : > { %v607_v46 = vadd.f32 %v1431_v40, %v606_v44  ;;  %v647_v47 = vadd.f32 %v1431_v40, %v646_v45 }
 0x103   : > { %vm779_vm0 = vcmp.ge.f32.partialorder %v684_v42, 0.0  ;;  %v847_v48 = vmul.f32 %v1436_v41, %v684_v42  ;;  %vm795_vm1 = vcmp.ge.f32.partialorder %v724_v43, 0.0  ;;  %v863_v49 = vmul.f32 %v1436_v41, %v724_v43 }
 0x104   : > { %vm748_vm2 = vcmp.ge.f32.partialorder %v607_v46, 0.0  ;;  %v816_v50 = vmul.f32 %v1436_v41, %v607_v46  ;;  %vm764_vm3 = vcmp.ge.f32.partialorder %v647_v47, 0.0  ;;  %v832_v51 = vmul.f32 %v1436_v41, %v647_v47 }
 0x105   : > { %v911_v52 = vsel %vm779_vm0, %v684_v42, %v847_v48  ;;  %v927_v53 = vsel %vm795_vm1, %v724_v43, %v863_v49 }
 0x106   : > { %975 = vst [vmem:[%s1444_s13 + $0x158] sm:$0xff] %v911_v52  ;;  %v880_v54 = vsel %vm748_vm2, %v607_v46, %v816_v50  ;;  %v896_v55 = vsel %vm764_vm3, %v647_v47, %v832_v51 }
 0x107   : > { %991 = vst [vmem:[%s1444_s13 + $0x1d8] sm:$0xff] %v927_v53 }
 0x108   : > { %944 = vst [vmem:[%s1444_s13 + $0x60] sm:$0xff] %v880_v54  ;;  %v686_v56 = vpop.f32.mrf.mxu2  ;;  %v726_v57 = vpop.f32.mrf.mxu3 }
 0x109   : > { %960 = vst [vmem:[%s1444_s13 + $0xe0] sm:$0xff] %v896_v55  ;;  %v687_v58 = vadd.f32 %v1431_v40, %v686_v56  ;;  %v727_v59 = vadd.f32 %v1431_v40, %v726_v57  ;;  %v608_v60 = vpop.f32.mrf.mxu0  ;;  %v648_v61 = vpop.f32.mrf.mxu1 }
 0x10a   : > { %v609_v62 = vadd.f32 %v1431_v40, %v608_v60  ;;  %v649_v63 = vadd.f32 %v1431_v40, %v648_v61 }
 0x10b   : > { %vm780_vm4 = vcmp.ge.f32.partialorder %v687_v58, 0.0  ;;  %v848_v0 = vmul.f32 %v1436_v41, %v687_v58  ;;  %vm796_vm5 = vcmp.ge.f32.partialorder %v727_v59, 0.0  ;;  %v864_v1 = vmul.f32 %v1436_v41, %v727_v59 }
 0x10c   : > { %vm749_vm6 = vcmp.ge.f32.partialorder %v609_v62, 0.0  ;;  %v817_v2 = vmul.f32 %v1436_v41, %v609_v62  ;;  %vm765_vm7 = vcmp.ge.f32.partialorder %v649_v63, 0.0  ;;  %v833_v3 = vmul.f32 %v1436_v41, %v649_v63 }
 0x10d   : > { %v912_v4 = vsel %vm780_vm4, %v687_v58, %v848_v0  ;;  %v928_v5 = vsel %vm796_vm5, %v727_v59, %v864_v1 }
 0x10e   : > { %976 = vst [vmem:[%s1444_s13 + $0x160] sm:$0xff] %v912_v4  ;;  %v881_v6 = vsel %vm749_vm6, %v609_v62, %v817_v2  ;;  %v897_v7 = vsel %vm765_vm7, %v649_v63, %v833_v3 }
 0x10f   : > { %992 = vst [vmem:[%s1444_s13 + $0x1e0] sm:$0xff] %v928_v5 }
 0x110   : > { %945 = vst [vmem:[%s1444_s13 + $0x68] sm:$0xff] %v881_v6  ;;  %v688_v8 = vpop.f32.mrf.mxu2  ;;  %v728_v9 = vpop.f32.mrf.mxu3 }
 0x111   : > { %961 = vst [vmem:[%s1444_s13 + $0xe8] sm:$0xff] %v897_v7  ;;  %v689_v10 = vadd.f32 %v1431_v40, %v688_v8  ;;  %v729_v11 = vadd.f32 %v1431_v40, %v728_v9  ;;  %v611_v12 = vpop.f32.mrf.mxu0  ;;  %v651_v13 = vpop.f32.mrf.mxu1 }
 0x112   : > { %v612_v14 = vadd.f32 %v1431_v40, %v611_v12  ;;  %v652_v15 = vadd.f32 %v1431_v40, %v651_v13 }
 0x113   : > { %vm781_vm8 = vcmp.ge.f32.partialorder %v689_v10, 0.0  ;;  %v849_v16 = vmul.f32 %v1436_v41, %v689_v10  ;;  %vm797_vm9 = vcmp.ge.f32.partialorder %v729_v11, 0.0  ;;  %v865_v17 = vmul.f32 %v1436_v41, %v729_v11 }
 0x114   : > { %vm750_vm10 = vcmp.ge.f32.partialorder %v612_v14, 0.0  ;;  %v818_v18 = vmul.f32 %v1436_v41, %v612_v14  ;;  %vm766_vm11 = vcmp.ge.f32.partialorder %v652_v15, 0.0  ;;  %v834_v19 = vmul.f32 %v1436_v41, %v652_v15 }
 0x115   : > { %v913_v20 = vsel %vm781_vm8, %v689_v10, %v849_v16  ;;  %v929_v21 = vsel %vm797_vm9, %v729_v11, %v865_v17 }
 0x116   : > { %977 = vst [vmem:[%s1444_s13 + $0x168] sm:$0xff] %v913_v20  ;;  %v882_v22 = vsel %vm750_vm10, %v612_v14, %v818_v18  ;;  %v898_v23 = vsel %vm766_vm11, %v652_v15, %v834_v19 }
 0x117   : > { %993 = vst [vmem:[%s1444_s13 + $0x1e8] sm:$0xff] %v929_v21 }
 0x118   : > { %946 = vst [vmem:[%s1444_s13 + $0x70] sm:$0xff] %v882_v22  ;;  %v691_v24 = vpop.f32.mrf.mxu2  ;;  %v731_v25 = vpop.f32.mrf.mxu3 }
 0x119   : > { %962 = vst [vmem:[%s1444_s13 + $0xf0] sm:$0xff] %v898_v23  ;;  %v692_v26 = vadd.f32 %v1431_v40, %v691_v24  ;;  %v732_v27 = vadd.f32 %v1431_v40, %v731_v25  ;;  %v613_v28 = vpop.f32.mrf.mxu0  ;;  %v653_v29 = vpop.f32.mrf.mxu1 }
 0x11a   : > { %v614_v30 = vadd.f32 %v1431_v40, %v613_v28  ;;  %v654_v31 = vadd.f32 %v1431_v40, %v653_v29 }
 0x11b   : > { %vm782_vm12 = vcmp.ge.f32.partialorder %v692_v26, 0.0  ;;  %v850_v32 = vmul.f32 %v1436_v41, %v692_v26  ;;  %vm798_vm13 = vcmp.ge.f32.partialorder %v732_v27, 0.0  ;;  %v866_v33 = vmul.f32 %v1436_v41, %v732_v27 }
 0x11c   : > { %vm751_vm14 = vcmp.ge.f32.partialorder %v614_v30, 0.0  ;;  %v819_v34 = vmul.f32 %v1436_v41, %v614_v30  ;;  %vm767_vm15 = vcmp.ge.f32.partialorder %v654_v31, 0.0  ;;  %v835_v35 = vmul.f32 %v1436_v41, %v654_v31 }
 0x11d   : > { %v914_v36 = vsel %vm782_vm12, %v692_v26, %v850_v32  ;;  %v930_v37 = vsel %vm798_vm13, %v732_v27, %v866_v33 }
 0x11e   : > { %978 = vst [vmem:[%s1444_s13 + $0x170] sm:$0xff] %v914_v36  ;;  %v883_v38 = vsel %vm751_vm14, %v614_v30, %v819_v34  ;;  %v899_v39 = vsel %vm767_vm15, %v654_v31, %v835_v35 }
 0x11f   : > { %994 = vst [vmem:[%s1444_s13 + $0x1f0] sm:$0xff] %v930_v37 }
 0x120   : > { %947 = vst [vmem:[%s1444_s13 + $0x78] sm:$0xff] %v883_v38  ;;  %v693_v42 = vpop.f32.mrf.mxu2  ;;  %v733_v43 = vpop.f32.mrf.mxu3 }
 0x121   : > { %963 = vst [vmem:[%s1444_s13 + $0xf8] sm:$0xff] %v899_v39  ;;  %v694_v44 = vadd.f32 %v1431_v40, %v693_v42  ;;  %v734_v45 = vadd.f32 %v1431_v40, %v733_v43 }
 0x123   : > { %vm783_vm0 = vcmp.ge.f32.partialorder %v694_v44, 0.0  ;;  %v851_v46 = vmul.f32 %v1436_v41, %v694_v44  ;;  %vm799_vm1 = vcmp.ge.f32.partialorder %v734_v45, 0.0  ;;  %v867_v47 = vmul.f32 %v1436_v41, %v734_v45 }
 0x125   : > { %v915_v48 = vsel %vm783_vm0, %v694_v44, %v851_v46  ;;  %v931_v49 = vsel %vm799_vm1, %v734_v45, %v867_v47 }
 0x126   : > { %979 = vst [vmem:[%s1444_s13 + $0x178] sm:$0xff] %v915_v48 }
 0x127   : > { %995 = vst [vmem:[%s1444_s13 + $0x1f8] sm:$0xff] %v931_v49 }
 0x128 PF: > { %s14_s15 = sadd.s32 1, %s1306_s15  }
 0x129   : > { %p11_p4 = scmp.ge.s32.totalorder %s14_s15, 6  }
 0x12b   :  { %13 = sbr.rel (!%p11_p4) target bundleno = 1 (0x1), region = 66 }

</bundles_post_ra>
